<compile_context>
chip_gen: v7x
topology: tpu7x:2x2x1
jax: 0.10.0
libtpu: 0.0.40
codegen_flags: <defaults>
</compile_context>

<pallas_src>
import math

import jax
import jax.numpy as jnp
from jax.experimental import pallas as pl
from jax.experimental.pallas import tpu as pltpu

LN_EPS = 1e-5  # PyTorch nn.LayerNorm default

_STACKED_PARAM_ORDER = (
    "wqkv", "bqkv", "wo", "bo",
    "g1", "be1", "w1", "b1", "w2", "b2", "g2", "be2",
)


def _layernorm(h, gamma, beta):
    mu = jnp.mean(h, axis=-1, keepdims=True)
    var = jnp.mean((h - mu) ** 2, axis=-1, keepdims=True)
    return (h - mu) * jax.lax.rsqrt(var + LN_EPS) * gamma + beta


def _make_encoder_kernel(collect_attn):
    def kernel(x_ref,
               wqkv_ref, bqkv_ref, wo_ref, bo_ref,
               g1_ref, be1_ref, w1_ref, b1_ref, w2_ref, b2_ref,
               g2_ref, be2_ref,
               *out_refs):
        if collect_attn:
            y_ref, attn_ref = out_refs
        else:
            (y_ref,) = out_refs

        x = x_ref[0].astype(jnp.float32)            # (tb, L, D) f32 residual path
        tb, L, D = x.shape
        x2 = x.reshape(tb * L, D)                    # L % 8 == 0 -> sublane-safe
        x2_bf = x2.astype(jnp.bfloat16)

        # --- fused QKV projection: one bf16 MXU matmul against (D, 3D) ---
        scale = jnp.float32(1.0 / math.sqrt(D))
        qkv = jnp.dot(x2_bf, wqkv_ref[0],
                      preferred_element_type=jnp.float32) + bqkv_ref[0]
        # fold 1/sqrt(D) into q (O(L*D)) instead of scaling the (L, L) scores
        q = (qkv[:, :D] * scale).reshape(tb, L, D).astype(jnp.bfloat16)
        k = qkv[:, D:2 * D].reshape(tb, L, D).astype(jnp.bfloat16)
        v = qkv[:, 2 * D:].reshape(tb, L, D).astype(jnp.bfloat16)

        # --- scaled dot-product attention (batched, no explicit transpose) ---
        s = jnp.einsum("bqd,bkd->bqk", q, k, preferred_element_type=jnp.float32)
        m = jnp.max(s, axis=-1, keepdims=True)
        p = jnp.exp(s - m)
        attn = p * pl.reciprocal(jnp.sum(p, axis=-1, keepdims=True), approx=True)

        ctx = jnp.einsum("bqk,bkd->bqd", attn.astype(jnp.bfloat16), v,
                         preferred_element_type=jnp.float32)      # (tb, L, D)
        att_out = jnp.dot(ctx.reshape(tb * L, D).astype(jnp.bfloat16), wo_ref[0],
                          preferred_element_type=jnp.float32) + bo_ref[0]

        # --- residual + LayerNorm (norm_freq / norm_trend), f32 ---
        y1 = _layernorm(x2 + att_out, g1_ref[0], be1_ref[0])

        # --- MLPLayer: conv1(k=1) -> relu -> conv2(k=1) -> residual -> LN ---
        h = jnp.maximum(
            jnp.dot(y1.astype(jnp.bfloat16), w1_ref[0],
                    preferred_element_type=jnp.float32) + b1_ref[0],
            0.0,
        )
        z = jnp.dot(h.astype(jnp.bfloat16), w2_ref[0],
                    preferred_element_type=jnp.float32) + b2_ref[0]
        y2 = _layernorm(y1 + z, g2_ref[0], be2_ref[0])

        y_ref[0] = y2.reshape(tb, L, D).astype(y_ref.dtype)
        if collect_attn:
            attn_ref[0] = attn.astype(attn_ref.dtype)

    return kernel


def _stack_branch_params(pf, pt):
    """Stack freq/trend params on a leading branch axis; fuse QKV; bf16 weights."""
    def qkv_w(p):
        return jnp.concatenate([p["wq"], p["wk"], p["wv"]], axis=1)   # (D, 3D)

    def qkv_b(p):
        return jnp.concatenate([p["bq"], p["bk"], p["bv"]], axis=1)   # (1, 3D)

    return {
        # MXU matmul weights go in as bf16 (accumulation stays f32 in-kernel)
        "wqkv": jnp.stack([qkv_w(pf), qkv_w(pt)]).astype(jnp.bfloat16),
        "wo":   jnp.stack([pf["wo"], pt["wo"]]).astype(jnp.bfloat16),
        "w1":   jnp.stack([pf["w1"], pt["w1"]]).astype(jnp.bfloat16),
        "w2":   jnp.stack([pf["w2"], pt["w2"]]).astype(jnp.bfloat16),
        # biases / LayerNorm params stay f32 (VPU adds, LN math in f32)
        "bqkv": jnp.stack([qkv_b(pf), qkv_b(pt)]),
        "bo":   jnp.stack([pf["bo"], pt["bo"]]),
        "g1":   jnp.stack([pf["g1"], pt["g1"]]),
        "be1":  jnp.stack([pf["be1"], pt["be1"]]),
        "b1":   jnp.stack([pf["b1"], pt["b1"]]),
        "b2":   jnp.stack([pf["b2"], pt["b2"]]),
        "g2":   jnp.stack([pf["g2"], pt["g2"]]),
        "be2":  jnp.stack([pf["be2"], pt["be2"]]),
    }


def encoder_layer(x_freq, x_trend, params_freq, params_trend, attn_mask=None,
                  *, block_b=1, collect_attn=True):
    """EncoderLayer.forward equivalent: x = (x_freq, x_trend)."""
    # TODO(synk): attn_mask is not plumbed into the trend branch.
    B, L, D = x_freq.shape
    assert B % block_b == 0, "block_b must divide B"
    nb = B // block_b

    x = jnp.stack([x_freq, x_trend], axis=0)          # (2, B, L, D)
    params = _stack_branch_params(params_freq, params_trend)

    def param_spec(arr):
        nd = arr.ndim
        return pl.BlockSpec(
            (1,) + arr.shape[1:],
            # constant over the batch grid axis -> weight block stays resident
            lambda br, b, _nd=nd: (br,) + (0,) * (_nd - 1),
        )

    in_specs = [pl.BlockSpec((1, block_b, L, D), lambda br, b: (br, b, 0, 0))]
    in_specs += [param_spec(params[n]) for n in _STACKED_PARAM_ORDER]

    out_specs = [pl.BlockSpec((1, block_b, L, D), lambda br, b: (br, b, 0, 0))]
    out_shape = [jax.ShapeDtypeStruct((2, B, L, D), jnp.float32)]
    if collect_attn:
        out_specs.append(
            pl.BlockSpec((1, block_b, L, L), lambda br, b: (br, b, 0, 0)))
        out_shape.append(jax.ShapeDtypeStruct((2, B, L, L), jnp.float32))

    fn = pl.pallas_call(
        _make_encoder_kernel(collect_attn),
        out_shape=out_shape,
        grid_spec=pltpu.PrefetchScalarGridSpec(
            num_scalar_prefetch=0,
            grid=(2, nb),
            in_specs=in_specs,
            out_specs=out_specs,
        ),
        compiler_params=pltpu.CompilerParams(
            dimension_semantics=("parallel", "parallel"),
            vmem_limit_bytes=48 * 1024 * 1024,   # headroom below v7x's 64 MiB
        ),
    )
    outs = fn(x, *[params[n] for n in _STACKED_PARAM_ORDER])
    if collect_attn:
        y, attn = outs
        return [y[0], y[1]], [attn[0], attn[1]]
    y = outs[0]
    return [y[0], y[1]], [None, None]


# ------------------------ pure-JAX reference (for checking) ------------------
def _branch_ref(x, p):
    q = x @ p["wq"] + p["bq"]
    k = x @ p["wk"] + p["bk"]
    v = x @ p["wv"] + p["bv"]
    s = (q @ jnp.swapaxes(k, -1, -2)) / jnp.sqrt(jnp.float32(x.shape[-1]))
    attn = jax.nn.softmax(s, axis=-1)
    att_out = (attn @ v) @ p["wo"] + p["bo"]
    y1 = _layernorm(x + att_out, p["g1"], p["be1"])
    h = jax.nn.relu(y1 @ p["w1"] + p["b1"])
    z = h @ p["w2"] + p["b2"]
    y2 = _layernorm(y1 + z, p["g2"], p["be2"])
    return y2, attn


def make_branch_params(key, d_model, d_ff):
    ks = jax.random.split(key, 6)
    std = 0.02
    return {
        "wq": std * jax.random.normal(ks[0], (d_model, d_model), jnp.float32),
        "bq": jnp.zeros((1, d_model), jnp.float32),
        "wk": std * jax.random.normal(ks[1], (d_model, d_model), jnp.float32),
        "bk": jnp.zeros((1, d_model), jnp.float32),
        "wv": std * jax.random.normal(ks[2], (d_model, d_model), jnp.float32),
        "bv": jnp.zeros((1, d_model), jnp.float32),
        "wo": std * jax.random.normal(ks[3], (d_model, d_model), jnp.float32),
        "bo": jnp.zeros((1, d_model), jnp.float32),
        "g1": jnp.ones((1, d_model), jnp.float32),
        "be1": jnp.zeros((1, d_model), jnp.float32),
        "w1": std * jax.random.normal(ks[4], (d_model, d_ff), jnp.float32),
        "b1": jnp.zeros((1, d_ff), jnp.float32),
        "w2": std * jax.random.normal(ks[5], (d_ff, d_model), jnp.float32),
        "b2": jnp.zeros((1, d_model), jnp.float32),
        "g2": jnp.ones((1, d_model), jnp.float32),
        "be2": jnp.zeros((1, d_model), jnp.float32),
    }


if __name__ == "__main__":
    # Small but lane-dense shapes: D multiple of 128, L multiple of 8.
    B, L, D = 2, 8, 128
    d_ff = 4 * D

    key = jax.random.PRNGKey(0)
    k_xf, k_xt, k_pf, k_pt = jax.random.split(key, 4)

    x_freq = jax.random.normal(k_xf, (B, L, D), jnp.float32)
    x_trend = jax.random.normal(k_xt, (B, L, D), jnp.float32)
    params_freq = make_branch_params(k_pf, D, d_ff)
    params_trend = make_branch_params(k_pt, D, d_ff)

    (y_freq, y_trend), (attn_freq, attn_trend) = encoder_layer(
        x_freq, x_trend, params_freq, params_trend, attn_mask=None,
        block_b=1, collect_attn=True,
    )
    jax.block_until_ready((y_freq, y_trend, attn_freq, attn_trend))

    # correctness check vs. pure-f32 JAX reference (bf16 MXU inputs + approx
    # reciprocal => looser tolerances than the f32-only version)
    yf_ref, af_ref = _branch_ref(x_freq, params_freq)
    yt_ref, at_ref = _branch_ref(x_trend, params_trend)
    assert jnp.allclose(y_freq, yf_ref, atol=2e-2, rtol=2e-2)
    assert jnp.allclose(y_trend, yt_ref, atol=2e-2, rtol=2e-2)
    assert jnp.allclose(attn_freq, af_ref, atol=1e-2, rtol=1e-2)
    assert jnp.allclose(attn_trend, at_ref, atol=1e-2, rtol=1e-2)

    print("KERNEL_OK")
</pallas_src>

<mosaic_0001>
module attributes {stable_mosaic.version = 11 : i64} {
  func.func @kernel(%arg0: i32, %arg1: i32, %arg2: memref<1x1x8x128xf32, #tpu.memory_space<vmem>>, %arg3: memref<1x128x384xbf16, #tpu.memory_space<vmem>>, %arg4: memref<1x1x384xf32, #tpu.memory_space<vmem>>, %arg5: memref<1x128x128xbf16, #tpu.memory_space<vmem>>, %arg6: memref<1x1x128xf32, #tpu.memory_space<vmem>>, %arg7: memref<1x1x128xf32, #tpu.memory_space<vmem>>, %arg8: memref<1x1x128xf32, #tpu.memory_space<vmem>>, %arg9: memref<1x128x512xbf16, #tpu.memory_space<vmem>>, %arg10: memref<1x1x512xf32, #tpu.memory_space<vmem>>, %arg11: memref<1x512x128xbf16, #tpu.memory_space<vmem>>, %arg12: memref<1x1x128xf32, #tpu.memory_space<vmem>>, %arg13: memref<1x1x128xf32, #tpu.memory_space<vmem>>, %arg14: memref<1x1x128xf32, #tpu.memory_space<vmem>>, %arg15: memref<1x1x8x128xf32, #tpu.memory_space<vmem>>, %arg16: memref<1x1x8x8xf32, #tpu.memory_space<vmem>>) attributes {dimension_semantics = [#tpu.dimension_semantics<parallel>, #tpu.dimension_semantics<parallel>], iteration_bounds = array<i64: 2, 2>, scalar_prefetch = 0 : i64, scratch_operands = 0 : i64, tpu.core_type = #tpu.core_type<tc>, window_params = [{transform_indices = @transform_0, window_bounds = array<i64: 1, 1, 8, 128>}, {transform_indices = @transform_1, window_bounds = array<i64: 1, 128, 384>}, {transform_indices = @transform_2, window_bounds = array<i64: 1, 1, 384>}, {transform_indices = @transform_3, window_bounds = array<i64: 1, 128, 128>}, {transform_indices = @transform_4, window_bounds = array<i64: 1, 1, 128>}, {transform_indices = @transform_5, window_bounds = array<i64: 1, 1, 128>}, {transform_indices = @transform_6, window_bounds = array<i64: 1, 1, 128>}, {transform_indices = @transform_7, window_bounds = array<i64: 1, 128, 512>}, {transform_indices = @transform_8, window_bounds = array<i64: 1, 1, 512>}, {transform_indices = @transform_9, window_bounds = array<i64: 1, 512, 128>}, {transform_indices = @transform_10, window_bounds = array<i64: 1, 1, 128>}, {transform_indices = @transform_11, window_bounds = array<i64: 1, 1, 128>}, {transform_indices = @transform_12, window_bounds = array<i64: 1, 1, 128>}, {transform_indices = @transform_13, window_bounds = array<i64: 1, 1, 8, 128>}, {transform_indices = @transform_14, window_bounds = array<i64: 1, 1, 8, 8>}]} {
    %c0 = arith.constant 0 : index
    %c0_0 = arith.constant 0 : index
    %c0_1 = arith.constant 0 : index
    %c0_2 = arith.constant 0 : index
    %0 = vector.load %arg2[%c0, %c0_0, %c0_1, %c0_2] : memref<1x1x8x128xf32, #tpu.memory_space<vmem>>, vector<1x1x8x128xf32>
    %1 = vector.shape_cast %0 : vector<1x1x8x128xf32> to vector<1x8x128xf32>
    %2 = vector.shape_cast %1 : vector<1x8x128xf32> to vector<8x128xf32>
    %3 = arith.truncf %2 : vector<8x128xf32> to vector<8x128xbf16>
    %c0_3 = arith.constant 0 : index
    %c0_4 = arith.constant 0 : index
    %c0_5 = arith.constant 0 : index
    %4 = vector.load %arg3[%c0_3, %c0_4, %c0_5] : memref<1x128x384xbf16, #tpu.memory_space<vmem>>, vector<1x128x384xbf16>
    %5 = vector.shape_cast %4 : vector<1x128x384xbf16> to vector<128x384xbf16>
    %cst = arith.constant dense<0.000000e+00> : vector<8x384xf32>
    %6 = tpu.matmul %3, %5, %cst {dimension_numbers = #tpu.dot_dimension_numbers<[1], [0], [0], [1], [0, 0, 1, 1], [], []>} : vector<8x128xbf16>, vector<128x384xbf16>, vector<8x384xf32> -> vector<8x384xf32>
    %c0_6 = arith.constant 0 : index
    %c0_7 = arith.constant 0 : index
    %c0_8 = arith.constant 0 : index
    %7 = vector.load %arg4[%c0_6, %c0_7, %c0_8] : memref<1x1x384xf32, #tpu.memory_space<vmem>>, vector<1x1x384xf32>
    %8 = vector.shape_cast %7 : vector<1x1x384xf32> to vector<1x384xf32>
    %9 = vector.broadcast %8 : vector<1x384xf32> to vector<8x384xf32>
    %10 = arith.addf %6, %9 : vector<8x384xf32>
    %11 = vector.extract_strided_slice %10 {offsets = [0, 0], sizes = [8, 128], strides = [1, 1]} : vector<8x384xf32> to vector<8x128xf32>
    %cst_9 = arith.constant 0.0883883461 : f32
    %12 = vector.broadcast %cst_9 : f32 to vector<8x128xf32>
    %13 = arith.mulf %11, %12 : vector<8x128xf32>
    %14 = vector.shape_cast %13 : vector<8x128xf32> to vector<1x8x128xf32>
    %15 = arith.truncf %14 : vector<1x8x128xf32> to vector<1x8x128xbf16>
    %16 = vector.extract_strided_slice %10 {offsets = [0, 128], sizes = [8, 128], strides = [1, 1]} : vector<8x384xf32> to vector<8x128xf32>
    %17 = vector.shape_cast %16 : vector<8x128xf32> to vector<1x8x128xf32>
    %18 = arith.truncf %17 : vector<1x8x128xf32> to vector<1x8x128xbf16>
    %19 = vector.extract_strided_slice %10 {offsets = [0, 256], sizes = [8, 128], strides = [1, 1]} : vector<8x384xf32> to vector<8x128xf32>
    %20 = vector.shape_cast %19 : vector<8x128xf32> to vector<1x8x128xf32>
    %21 = arith.truncf %20 : vector<1x8x128xf32> to vector<1x8x128xbf16>
    "tpu.trace_start"() <{level = 10 : i32, message = "bqd,bkd->bqk"}> : () -> ()
    %cst_10 = arith.constant dense<0.000000e+00> : vector<1x8x8xf32>
    %22 = tpu.matmul %15, %18, %cst_10 {dimension_numbers = #tpu.dot_dimension_numbers<[2], [2], [1], [1], [0, 0, 0, 1, 1, 1], [0], [0]>} : vector<1x8x128xbf16>, vector<1x8x128xbf16>, vector<1x8x8xf32> -> vector<1x8x8xf32>
    "tpu.trace_stop"() : () -> ()
    %cst_11 = arith.constant dense<0xFF800000> : vector<1x8xf32>
    %23 = vector.multi_reduction <maximumf>, %22, %cst_11 [2] : vector<1x8x8xf32> to vector<1x8xf32>
    %24 = vector.shape_cast %23 : vector<1x8xf32> to vector<1x8x1xf32>
    %25 = vector.broadcast %24 : vector<1x8x1xf32> to vector<1x8x8xf32>
    %26 = arith.subf %22, %25 : vector<1x8x8xf32>
    %27 = math.exp %26 : vector<1x8x8xf32>
    %cst_12 = arith.constant dense<0.000000e+00> : vector<1x8xf32>
    %28 = vector.multi_reduction <add>, %27, %cst_12 [2] : vector<1x8x8xf32> to vector<1x8xf32>
    %29 = vector.shape_cast %28 : vector<1x8xf32> to vector<1x8x1xf32>
    %30 = tpu.reciprocal %29 {approx = true} : vector<1x8x1xf32> -> vector<1x8x1xf32>
    %31 = vector.broadcast %30 : vector<1x8x1xf32> to vector<1x8x8xf32>
    %32 = arith.mulf %27, %31 : vector<1x8x8xf32>
    %33 = arith.truncf %32 : vector<1x8x8xf32> to vector<1x8x8xbf16>
    "tpu.trace_start"() <{level = 10 : i32, message = "bqk,bkd->bqd"}> : () -> ()
    %cst_13 = arith.constant dense<0.000000e+00> : vector<1x8x128xf32>
    %34 = tpu.matmul %33, %21, %cst_13 {dimension_numbers = #tpu.dot_dimension_numbers<[2], [1], [1], [2], [0, 0, 0, 1, 1, 2], [0], [0]>} : vector<1x8x8xbf16>, vector<1x8x128xbf16>, vector<1x8x128xf32> -> vector<1x8x128xf32>
    "tpu.trace_stop"() : () -> ()
    %35 = vector.shape_cast %34 : vector<1x8x128xf32> to vector<8x128xf32>
    %36 = arith.truncf %35 : vector<8x128xf32> to vector<8x128xbf16>
    %c0_14 = arith.constant 0 : index
    %c0_15 = arith.constant 0 : index
    %c0_16 = arith.constant 0 : index
    %37 = vector.load %arg5[%c0_14, %c0_15, %c0_16] : memref<1x128x128xbf16, #tpu.memory_space<vmem>>, vector<1x128x128xbf16>
    %38 = vector.shape_cast %37 : vector<1x128x128xbf16> to vector<128x128xbf16>
    %cst_17 = arith.constant dense<0.000000e+00> : vector<8x128xf32>
    %39 = tpu.matmul %36, %38, %cst_17 {dimension_numbers = #tpu.dot_dimension_numbers<[1], [0], [0], [1], [0, 0, 1, 1], [], []>} : vector<8x128xbf16>, vector<128x128xbf16>, vector<8x128xf32> -> vector<8x128xf32>
    %c0_18 = arith.constant 0 : index
    %c0_19 = arith.constant 0 : index
    %c0_20 = arith.constant 0 : index
    %40 = vector.load %arg6[%c0_18, %c0_19, %c0_20] : memref<1x1x128xf32, #tpu.memory_space<vmem>>, vector<1x1x128xf32>
    %41 = vector.shape_cast %40 : vector<1x1x128xf32> to vector<1x128xf32>
    %42 = vector.broadcast %41 : vector<1x128xf32> to vector<8x128xf32>
    %43 = arith.addf %39, %42 : vector<8x128xf32>
    %44 = arith.addf %2, %43 : vector<8x128xf32>
    %c0_21 = arith.constant 0 : index
    %c0_22 = arith.constant 0 : index
    %c0_23 = arith.constant 0 : index
    %45 = vector.load %arg7[%c0_21, %c0_22, %c0_23] : memref<1x1x128xf32, #tpu.memory_space<vmem>>, vector<1x1x128xf32>
    %46 = vector.shape_cast %45 : vector<1x1x128xf32> to vector<1x128xf32>
    %c0_24 = arith.constant 0 : index
    %c0_25 = arith.constant 0 : index
    %c0_26 = arith.constant 0 : index
    %47 = vector.load %arg8[%c0_24, %c0_25, %c0_26] : memref<1x1x128xf32, #tpu.memory_space<vmem>>, vector<1x1x128xf32>
    %48 = vector.shape_cast %47 : vector<1x1x128xf32> to vector<1x128xf32>
    %cst_27 = arith.constant dense<0.000000e+00> : vector<8xf32>
    %49 = vector.multi_reduction <add>, %44, %cst_27 [1] : vector<8x128xf32> to vector<8xf32>
    %50 = vector.shape_cast %49 : vector<8xf32> to vector<8x1xf32>
    %cst_28 = arith.constant 1.280000e+02 : f32
    %51 = vector.broadcast %cst_28 : f32 to vector<8x1xf32>
    %52 = arith.divf %50, %51 : vector<8x1xf32>
    %53 = vector.broadcast %52 : vector<8x1xf32> to vector<8x128xf32>
    %54 = arith.subf %44, %53 : vector<8x128xf32>
    %55 = arith.mulf %54, %54 : vector<8x128xf32>
    %cst_29 = arith.constant dense<0.000000e+00> : vector<8xf32>
    %56 = vector.multi_reduction <add>, %55, %cst_29 [1] : vector<8x128xf32> to vector<8xf32>
    %57 = vector.shape_cast %56 : vector<8xf32> to vector<8x1xf32>
    %cst_30 = arith.constant 1.280000e+02 : f32
    %58 = vector.broadcast %cst_30 : f32 to vector<8x1xf32>
    %59 = arith.divf %57, %58 : vector<8x1xf32>
    %60 = vector.broadcast %52 : vector<8x1xf32> to vector<8x128xf32>
    %61 = arith.subf %44, %60 : vector<8x128xf32>
    %cst_31 = arith.constant 9.99999974E-6 : f32
    %62 = vector.broadcast %cst_31 : f32 to vector<8x1xf32>
    %63 = arith.addf %59, %62 : vector<8x1xf32>
    %64 = math.rsqrt %63 : vector<8x1xf32>
    %65 = vector.broadcast %64 : vector<8x1xf32> to vector<8x128xf32>
    %66 = arith.mulf %61, %65 : vector<8x128xf32>
    %67 = vector.broadcast %46 : vector<1x128xf32> to vector<8x128xf32>
    %68 = arith.mulf %66, %67 : vector<8x128xf32>
    %69 = vector.broadcast %48 : vector<1x128xf32> to vector<8x128xf32>
    %70 = arith.addf %68, %69 : vector<8x128xf32>
    %71 = arith.truncf %70 : vector<8x128xf32> to vector<8x128xbf16>
    %c0_32 = arith.constant 0 : index
    %c0_33 = arith.constant 0 : index
    %c0_34 = arith.constant 0 : index
    %72 = vector.load %arg9[%c0_32, %c0_33, %c0_34] : memref<1x128x512xbf16, #tpu.memory_space<vmem>>, vector<1x128x512xbf16>
    %73 = vector.shape_cast %72 : vector<1x128x512xbf16> to vector<128x512xbf16>
    %cst_35 = arith.constant dense<0.000000e+00> : vector<8x512xf32>
    %74 = tpu.matmul %71, %73, %cst_35 {dimension_numbers = #tpu.dot_dimension_numbers<[1], [0], [0], [1], [0, 0, 1, 1], [], []>} : vector<8x128xbf16>, vector<128x512xbf16>, vector<8x512xf32> -> vector<8x512xf32>
    %c0_36 = arith.constant 0 : index
    %c0_37 = arith.constant 0 : index
    %c0_38 = arith.constant 0 : index
    %75 = vector.load %arg10[%c0_36, %c0_37, %c0_38] : memref<1x1x512xf32, #tpu.memory_space<vmem>>, vector<1x1x512xf32>
    %76 = vector.shape_cast %75 : vector<1x1x512xf32> to vector<1x512xf32>
    %77 = vector.broadcast %76 : vector<1x512xf32> to vector<8x512xf32>
    %78 = arith.addf %74, %77 : vector<8x512xf32>
    %cst_39 = arith.constant 0.000000e+00 : f32
    %79 = vector.broadcast %cst_39 : f32 to vector<8x512xf32>
    %80 = arith.maximumf %78, %79 : vector<8x512xf32>
    %81 = arith.truncf %80 : vector<8x512xf32> to vector<8x512xbf16>
    %c0_40 = arith.constant 0 : index
    %c0_41 = arith.constant 0 : index
    %c0_42 = arith.constant 0 : index
    %82 = vector.load %arg11[%c0_40, %c0_41, %c0_42] : memref<1x512x128xbf16, #tpu.memory_space<vmem>>, vector<1x512x128xbf16>
    %83 = vector.shape_cast %82 : vector<1x512x128xbf16> to vector<512x128xbf16>
    %cst_43 = arith.constant dense<0.000000e+00> : vector<8x128xf32>
    %84 = tpu.matmul %81, %83, %cst_43 {dimension_numbers = #tpu.dot_dimension_numbers<[1], [0], [0], [1], [0, 0, 1, 1], [], []>} : vector<8x512xbf16>, vector<512x128xbf16>, vector<8x128xf32> -> vector<8x128xf32>
    %c0_44 = arith.constant 0 : index
    %c0_45 = arith.constant 0 : index
    %c0_46 = arith.constant 0 : index
    %85 = vector.load %arg12[%c0_44, %c0_45, %c0_46] : memref<1x1x128xf32, #tpu.memory_space<vmem>>, vector<1x1x128xf32>
    %86 = vector.shape_cast %85 : vector<1x1x128xf32> to vector<1x128xf32>
    %87 = vector.broadcast %86 : vector<1x128xf32> to vector<8x128xf32>
    %88 = arith.addf %84, %87 : vector<8x128xf32>
    %89 = arith.addf %70, %88 : vector<8x128xf32>
    %c0_47 = arith.constant 0 : index
    %c0_48 = arith.constant 0 : index
    %c0_49 = arith.constant 0 : index
    %90 = vector.load %arg13[%c0_47, %c0_48, %c0_49] : memref<1x1x128xf32, #tpu.memory_space<vmem>>, vector<1x1x128xf32>
    %91 = vector.shape_cast %90 : vector<1x1x128xf32> to vector<1x128xf32>
    %c0_50 = arith.constant 0 : index
    %c0_51 = arith.constant 0 : index
    %c0_52 = arith.constant 0 : index
    %92 = vector.load %arg14[%c0_50, %c0_51, %c0_52] : memref<1x1x128xf32, #tpu.memory_space<vmem>>, vector<1x1x128xf32>
    %93 = vector.shape_cast %92 : vector<1x1x128xf32> to vector<1x128xf32>
    %cst_53 = arith.constant dense<0.000000e+00> : vector<8xf32>
    %94 = vector.multi_reduction <add>, %89, %cst_53 [1] : vector<8x128xf32> to vector<8xf32>
    %95 = vector.shape_cast %94 : vector<8xf32> to vector<8x1xf32>
    %cst_54 = arith.constant 1.280000e+02 : f32
    %96 = vector.broadcast %cst_54 : f32 to vector<8x1xf32>
    %97 = arith.divf %95, %96 : vector<8x1xf32>
    %98 = vector.broadcast %97 : vector<8x1xf32> to vector<8x128xf32>
    %99 = arith.subf %89, %98 : vector<8x128xf32>
    %100 = arith.mulf %99, %99 : vector<8x128xf32>
    %cst_55 = arith.constant dense<0.000000e+00> : vector<8xf32>
    %101 = vector.multi_reduction <add>, %100, %cst_55 [1] : vector<8x128xf32> to vector<8xf32>
    %102 = vector.shape_cast %101 : vector<8xf32> to vector<8x1xf32>
    %cst_56 = arith.constant 1.280000e+02 : f32
    %103 = vector.broadcast %cst_56 : f32 to vector<8x1xf32>
    %104 = arith.divf %102, %103 : vector<8x1xf32>
    %105 = vector.broadcast %97 : vector<8x1xf32> to vector<8x128xf32>
    %106 = arith.subf %89, %105 : vector<8x128xf32>
    %cst_57 = arith.constant 9.99999974E-6 : f32
    %107 = vector.broadcast %cst_57 : f32 to vector<8x1xf32>
    %108 = arith.addf %104, %107 : vector<8x1xf32>
    %109 = math.rsqrt %108 : vector<8x1xf32>
    %110 = vector.broadcast %109 : vector<8x1xf32> to vector<8x128xf32>
    %111 = arith.mulf %106, %110 : vector<8x128xf32>
    %112 = vector.broadcast %91 : vector<1x128xf32> to vector<8x128xf32>
    %113 = arith.mulf %111, %112 : vector<8x128xf32>
    %114 = vector.broadcast %93 : vector<1x128xf32> to vector<8x128xf32>
    %115 = arith.addf %113, %114 : vector<8x128xf32>
    %116 = vector.shape_cast %115 : vector<8x128xf32> to vector<1x8x128xf32>
    %c0_58 = arith.constant 0 : index
    %c0_59 = arith.constant 0 : index
    %c0_60 = arith.constant 0 : index
    %c0_61 = arith.constant 0 : index
    %117 = vector.load %arg15[%c0_58, %c0_59, %c0_60, %c0_61] : memref<1x1x8x128xf32, #tpu.memory_space<vmem>>, vector<1x1x8x128xf32>
    %118 = vector.shape_cast %117 : vector<1x1x8x128xf32> to vector<1x8x128xf32>
    %119 = vector.shape_cast %116 : vector<1x8x128xf32> to vector<1x1x8x128xf32>
    tpu.vector_store %arg15[%c0_58, %c0_59, %c0_60, %c0_61], %119 {strides = array<i32>} : memref<1x1x8x128xf32, #tpu.memory_space<vmem>>, vector<1x1x8x128xf32>,
    %c0_62 = arith.constant 0 : index
    %c0_63 = arith.constant 0 : index
    %c0_64 = arith.constant 0 : index
    %c0_65 = arith.constant 0 : index
    %120 = vector.load %arg16[%c0_62, %c0_63, %c0_64, %c0_65] : memref<1x1x8x8xf32, #tpu.memory_space<vmem>>, vector<1x1x8x8xf32>
    %121 = vector.shape_cast %120 : vector<1x1x8x8xf32> to vector<1x8x8xf32>
    %122 = vector.shape_cast %32 : vector<1x8x8xf32> to vector<1x1x8x8xf32>
    tpu.vector_store %arg16[%c0_62, %c0_63, %c0_64, %c0_65], %122 {strides = array<i32>} : memref<1x1x8x8xf32, #tpu.memory_space<vmem>>, vector<1x1x8x8xf32>,
    return
  }
  func.func @transform_0(%arg0: i32, %arg1: i32) -> (i32, i32, i32, i32) {
    %c0_i32 = arith.constant 0 : i32
    %c0_i32_0 = arith.constant 0 : i32
    %c0_i32_1 = arith.constant 0 : i32
    return %arg0, %arg1, %c0_i32, %c0_i32_0 : i32, i32, i32, i32
  }
  func.func @transform_1(%arg0: i32, %arg1: i32) -> (i32, i32, i32) {
    %c0_i32 = arith.constant 0 : i32
    %c0_i32_0 = arith.constant 0 : i32
    %c0_i32_1 = arith.constant 0 : i32
    return %arg0, %c0_i32, %c0_i32_0 : i32, i32, i32
  }
  func.func @transform_2(%arg0: i32, %arg1: i32) -> (i32, i32, i32) {
    %c0_i32 = arith.constant 0 : i32
    %c0_i32_0 = arith.constant 0 : i32
    %c0_i32_1 = arith.constant 0 : i32
    return %arg0, %c0_i32, %c0_i32_0 : i32, i32, i32
  }
  func.func @transform_3(%arg0: i32, %arg1: i32) -> (i32, i32, i32) {
    %c0_i32 = arith.constant 0 : i32
    %c0_i32_0 = arith.constant 0 : i32
    %c0_i32_1 = arith.constant 0 : i32
    return %arg0, %c0_i32, %c0_i32_0 : i32, i32, i32
  }
  func.func @transform_4(%arg0: i32, %arg1: i32) -> (i32, i32, i32) {
    %c0_i32 = arith.constant 0 : i32
    %c0_i32_0 = arith.constant 0 : i32
    %c0_i32_1 = arith.constant 0 : i32
    return %arg0, %c0_i32, %c0_i32_0 : i32, i32, i32
  }
  func.func @transform_5(%arg0: i32, %arg1: i32) -> (i32, i32, i32) {
    %c0_i32 = arith.constant 0 : i32
    %c0_i32_0 = arith.constant 0 : i32
    %c0_i32_1 = arith.constant 0 : i32
    return %arg0, %c0_i32, %c0_i32_0 : i32, i32, i32
  }
  func.func @transform_6(%arg0: i32, %arg1: i32) -> (i32, i32, i32) {
    %c0_i32 = arith.constant 0 : i32
    %c0_i32_0 = arith.constant 0 : i32
    %c0_i32_1 = arith.constant 0 : i32
    return %arg0, %c0_i32, %c0_i32_0 : i32, i32, i32
  }
  func.func @transform_7(%arg0: i32, %arg1: i32) -> (i32, i32, i32) {
    %c0_i32 = arith.constant 0 : i32
    %c0_i32_0 = arith.constant 0 : i32
    %c0_i32_1 = arith.constant 0 : i32
    return %arg0, %c0_i32, %c0_i32_0 : i32, i32, i32
  }
  func.func @transform_8(%arg0: i32, %arg1: i32) -> (i32, i32, i32) {
    %c0_i32 = arith.constant 0 : i32
    %c0_i32_0 = arith.constant 0 : i32
    %c0_i32_1 = arith.constant 0 : i32
    return %arg0, %c0_i32, %c0_i32_0 : i32, i32, i32
  }
  func.func @transform_9(%arg0: i32, %arg1: i32) -> (i32, i32, i32) {
    %c0_i32 = arith.constant 0 : i32
    %c0_i32_0 = arith.constant 0 : i32
    %c0_i32_1 = arith.constant 0 : i32
    return %arg0, %c0_i32, %c0_i32_0 : i32, i32, i32
  }
  func.func @transform_10(%arg0: i32, %arg1: i32) -> (i32, i32, i32) {
    %c0_i32 = arith.constant 0 : i32
    %c0_i32_0 = arith.constant 0 : i32
    %c0_i32_1 = arith.constant 0 : i32
    return %arg0, %c0_i32, %c0_i32_0 : i32, i32, i32
  }
  func.func @transform_11(%arg0: i32, %arg1: i32) -> (i32, i32, i32) {
    %c0_i32 = arith.constant 0 : i32
    %c0_i32_0 = arith.constant 0 : i32
    %c0_i32_1 = arith.constant 0 : i32
    return %arg0, %c0_i32, %c0_i32_0 : i32, i32, i32
  }
  func.func @transform_12(%arg0: i32, %arg1: i32) -> (i32, i32, i32) {
    %c0_i32 = arith.constant 0 : i32
    %c0_i32_0 = arith.constant 0 : i32
    %c0_i32_1 = arith.constant 0 : i32
    return %arg0, %c0_i32, %c0_i32_0 : i32, i32, i32
  }
  func.func @transform_13(%arg0: i32, %arg1: i32) -> (i32, i32, i32, i32) {
    %c0_i32 = arith.constant 0 : i32
    %c0_i32_0 = arith.constant 0 : i32
    %c0_i32_1 = arith.constant 0 : i32
    return %arg0, %arg1, %c0_i32, %c0_i32_0 : i32, i32, i32, i32
  }
  func.func @transform_14(%arg0: i32, %arg1: i32) -> (i32, i32, i32, i32) {
    %c0_i32 = arith.constant 0 : i32
    %c0_i32_0 = arith.constant 0 : i32
    %c0_i32_1 = arith.constant 0 : i32
    return %arg0, %arg1, %c0_i32, %c0_i32_0 : i32, i32, i32, i32
  }
}

</mosaic_0001>

<bundles_post_ra>
// kernel: tpu_custom_call.1
= control target key start
LH: loop header
LB: loop body
LE: loop exit
PB: predicated region body
PF: predicated region fallthrough
CT: control target
= control target key end

     0   :  { %s3997_s0 = inlined_call_operand.hbm [shape: f32[2,2,8,128], index: 0, kind: input, shape index: {}]   ;;  %s3998_s1 = inlined_call_operand.hbm [shape: bf16[2,128,384], index: 1, kind: input, shape index: {}]   ;;  %s3999_s2 = inlined_call_operand.vmem [shape: f32[2,1,384], index: 2, kind: input, shape index: {}]   ;;  %s4000_s3 = inlined_call_operand.hbm [shape: bf16[2,128,128], index: 3, kind: input, shape index: {}]   ;;  %s4001_s4 = inlined_call_operand.hbm [shape: f32[2,1,128], index: 4, kind: input, shape index: {}]   ;;  %s4002_s5 = inlined_call_operand.vmem [shape: f32[2,1,128], index: 5, kind: input, shape index: {}]   ;;  %s4003_s6 = inlined_call_operand.vmem [shape: f32[2,1,128], index: 6, kind: input, shape index: {}]   ;;  %s4004_s7 = inlined_call_operand.hbm [shape: bf16[2,128,512], index: 7, kind: input, shape index: {}]   ;;  %s4005_s8 = inlined_call_operand.vmem [shape: f32[2,1,512], index: 8, kind: input, shape index: {}]   ;;  %s4006_s9 = inlined_call_operand.hbm [shape: bf16[2,512,128], index: 9, kind: input, shape index: {}]   ;;  %s4007_s10 = inlined_call_operand.vmem [shape: f32[2,1,128], index: 10, kind: input, shape index: {}]   ;;  %s4008_s11 = inlined_call_operand.vmem [shape: f32[2,1,128], index: 11, kind: input, shape index: {}]   ;;  %s4009_s12 = inlined_call_operand.vmem [shape: f32[2,1,128], index: 12, kind: input, shape index: {}]   ;;  %s4010_s13 = inlined_call_operand.hbm [shape: f32[2,2,8,128], index: 13, kind: output, shape index: {0}]   ;;  %s4011_s14 = inlined_call_operand.hbm [shape: f32[2,2,8,8], index: 14, kind: output, shape index: {1}]  }
   0x1   :  { %4031 = sst [smem:[#allocation33_spill]] %s3998_s1 }
   0x2   :  { %4032 = sst [smem:[#allocation34_spill]] %s3999_s2 }
   0x3   :  { %4033 = sst [smem:[#allocation35_spill]] %s4001_s4 }
   0x4   :  { %4034 = sst [smem:[#allocation36_spill]] %s4002_s5 }
   0x5   :  { %4035 = sst [smem:[#allocation37_spill]] %s4003_s6 }
   0x6   :  { %4036 = sst [smem:[#allocation38_spill]] %s4005_s8 }
   0x7   :  { %4037 = sst [smem:[#allocation39_spill]] %s4007_s10 }
   0x8   :  { %4038 = sst [smem:[#allocation40_spill]] %s4008_s11 }
   0x9   :  { %4039 = sst [smem:[#allocation41_spill]] %s4009_s12 }
   0xa   :  { %4040 = sst [smem:[#allocation42_spill]] %s4010_s13 }
   0xb   :  { %4041 = sst [smem:[#allocation43_spill]] %s4011_s14 }
   0xc   :  { %20 = vsyncpa [#allocation3], 0 }
   0xd   :  { %22 = vsyncpa [#allocation3 + $0x1], 0 }
   0xe   :  { %23 = vsyncpa [#allocation6], 0 }
   0xf   :  { %25 = vsyncpa [#allocation6 + $0x1], 0 }
  0x10   :  { %26 = vsyncpa [#allocation9], 0 }
  0x11   :  { %28 = vsyncpa [#allocation9 + $0x1], 0 }
  0x12   :  { %29 = vsyncpa [#allocation12], 0 }
  0x13   :  { %31 = vsyncpa [#allocation12 + $0x1], 0 }
  0x14   :  { %32 = vsyncpa [#allocation4], 0 }
  0x15   :  { %34 = vsyncpa [#allocation4 + $0x1], 0 }
  0x16   :  { %35 = vsyncpa [#allocation15], 0 }
  0x17   :  { %37 = vsyncpa [#allocation15 + $0x1], 0  ;;  %s3291_s29 = smov 0   ;;  %s3293_s30 = smov 0  }
  0x18   :  { %s3295_s15 = smov 0   ;;  %s3297_s16 = smov 0  }
  0x19   :  { %s3299_s17 = smov 0   ;;  %s3301_s18 = smov 0  }
  0x1a   :  { %s3303_s19 = smov 0   ;;  %s3305_s20 = smov 0  }
  0x1b   :  { %s3307_s21 = smov 0   ;;  %s3309_s22 = smov 0  }
  0x1c   :  { %s3311_s23 = smov 0  }
  0x1d LB: > { %4042 = sst [smem:[#allocation22_spill]] %s3165_s15  ;;  %p4015_p0 = scmp.eq.s32.totalorder %s3197_s23, 0  ;;  %s3197_s23 = sphi %s3311_s23, %s43_s23   ;;  %s3193_s22 = sphi %s3309_s22, %s4102_s22   ;;  %s3189_s21 = sphi %s3307_s21, %s4101_s21   ;;  %s3185_s20 = sphi %s3305_s20, %s4100_s20   ;;  %s3181_s19 = sphi %s3303_s19, %s4093_s19   ;;  %s3177_s18 = sphi %s3301_s18, %s4092_s18   ;;  %s3173_s17 = sphi %s3299_s17, %s4099_s17   ;;  %s3169_s16 = sphi %s3297_s16, %s4098_s16   ;;  %s3165_s15 = sphi %s3295_s15, %s4090_s15   ;;  %s3161_s30 = sphi %s3293_s30, %s4097_s30   ;;  %s3157_s29 = sphi %s3291_s29, %s4096_s29  }
  0x1e   : > { %4043 = sst [smem:[#allocation23_spill]] %s3177_s18  ;;  %p97_p1 = scmp.ne.s32.totalorder %s3165_s15, %s3161_s30 }
  0x1f   : > { %4044 = sst [smem:[#allocation24_spill]] %s3181_s19  ;;  %p4014_p2 = scmp.lt.s32.totalorder %s3197_s23, 4 }
  0x20   : > { %4045 = sst [smem:[#allocation25_spill]] %s3185_s20  ;;  %p99_p3 = por %p97_p1, %p4015_p0 }
  0x21   : > { %4046 = sst [smem:[#allocation26_spill]] %s3189_s21  ;;  %s3354_s25 = sand.u32 1, %s3165_s15  }
  0x22   : > { %s2578_s26 = smul.u32 192, %s3354_s25  ;;  %p3359_p4 = pnand %p4014_p2, %p99_p3 }
  0x23   : > { %s2579_s28 = smul.u32 3072, %s3193_s22  ;;  %s4048_s1 = sld [smem:[#allocation33_spill]] }
  0x24   : > { %s4047_s27 = scalar_select %p3359_p4, 1, 0 }
  0x25   : > { %s493_s24 = scalar_lea.vmem [#allocation5], %s2578_s26  ;;  %s4049_s19 = sand.u32 1, %s3197_s23  }
  0x26   : > { %s500_s14 = sshll.u32 %s493_s24, 4  ;;  %s3373_s10 = scalar_lea.sflag [#allocation6], %s4049_s19  ;;  %s3369_s14 = int_to_ptr.vmem [resolvable:$true] %s500_s14 }
  0x27   : > { %p3379_p6 = pneg %p3359_p4 }
  0x29   : > { %s3367_s11 = scalar_lea.hbm %s4048_s1, %s2579_s28  ;;  %s2856_s24 = scalar_lea.hbm %s4048_s1, 6144 }
  0x2a   : > { %s2851_s8 = scalar_lea.hbm %s3367_s11, 3072  ;;  %p2857_p9 = scmp.lt.u32.totalorder %s3367_s11, %s4048_s1 }
  0x2b   : > { %p2852_p5 = scmp.ne.s32.totalorder %s3367_s11, %s2851_s8  ;;  %p2858_p10 = scmp.lt.u32.totalorder %s2856_s24, %s2851_s8 }
  0x2c   : > { %p2860_p12 = scmp.lt.u32.totalorder %s2851_s8, %s3367_s11 }
  0x2d   : > { %p2854_p7 = pnand %p3379_p6, %p2852_p5  ;;  %p2859_p11 = por %p2858_p10, %p2857_p9 }
  0x2f   : > { %p2855_p8 = pneg %p2854_p7  ;;  %p2861_p13 = por %p2860_p12, %p2859_p11 }
  0x31   : > { %p2862_p1 = pnand %p2861_p13, %p2855_p8 }
  0x33   : > { %2865 = shalt.err (!%p2862_p1)
}
  0x34   : > { %s2866_s19 = scalar_lea.vmem %s3369_s14, 3072  ;;  %s3199_s12 = smov [#allocation5]  }
  0x35   : > { %p2867_p3 = scmp.ne.s32.totalorder %s3369_s14, %s2866_s19  ;;  %s2871_s13 = sshll.u32 %s3199_s12, 4  ;;  %s2872_s13 = int_to_ptr.vmem [resolvable:$false] %s2871_s13 }
  0x36   : > { %s2873_s26 = scalar_lea.vmem %s2872_s13, 6144  ;;  %p2874_p2 = scmp.lt.s32.totalorder %s3369_s14, %s2872_s13 }
  0x37   : > { %p2869_p5 = pnand %p2867_p3, %p3379_p6  ;;  %p2875_p0 = scmp.lt.s32.totalorder %s2873_s26, %s2866_s19 }
  0x39   : > { %p2870_p7 = pneg %p2869_p5  ;;  %p2876_p9 = por %p2875_p0, %p2874_p2 }
  0x3b   : > { %p2877_p10 = pnand %p2876_p9, %p2870_p7 }
  0x3d   : > { %2880 = shalt.err (!%p2877_p10)
}
  0x3e   : > { %s3200_s8 = smov 192   ;;  %s3201_s24 = smov 12  }
  0x3f   : > { %2604 = dma.hbm_to_vmem [thread:$0]  (!%p3359_p4), %s3367_s11, 3072, %s3369_s14, %s3373_s10, %s3200_s8, %s3200_s8, %s3201_s24  }
  0x40   : > { %p2338_p8 = scmp.ge.s32.totalorder %s3197_s23, 1  ;;  %p632_p11 = scmp.lt.s32.totalorder %s3197_s23, 5 }
  0x41   : > { %s2331_s19 = sshll.u32 %s3193_s22, 4  ;;  %s4053_s4 = sld [smem:[#allocation35_spill]] }
  0x42   : > { %p3405_p12 = pnand %p2338_p8, %p632_p11  ;;  %s541_s1 = scalar_lea.vmem [#allocation8], %s3354_s25 }
  0x43   : > { %s548_s5 = sshll.u32 %s541_s1, 4  ;;  %s4054_s11 = sand.u32 1, %s3197_s23   ;;  %s549_s5 = int_to_ptr.vmem [resolvable:$true] %s548_s5 }
  0x44   : > { %s4051_s28 = scalar_select %p3405_p12, 1, 0 }
  0x45   : > { %s3418_s14 = scalar_lea.sflag [#allocation9], %s4054_s11 }
  0x46   : > { %4052 = sst [smem:[#allocation27_spill]] %s4051_s28 }
  0x47   : > { %s3413_s26 = scalar_lea.hbm %s4053_s4, %s2331_s19  ;;  %s2886_s19 = scalar_lea.hbm %s4053_s4, 32 }
  0x48   : > { %s2881_s8 = scalar_lea.hbm %s3413_s26, 16  ;;  %p2887_p1 = scmp.lt.u32.totalorder %s3413_s26, %s4053_s4 }
  0x49   : > { %p2882_p0 = scmp.ne.s32.totalorder %s3413_s26, %s2881_s8  ;;  %p2888_p3 = scmp.lt.u32.totalorder %s2886_s19, %s2881_s8 }
  0x4a   : > { %p2890_p7 = scmp.lt.u32.totalorder %s2881_s8, %s3413_s26 }
  0x4b   : > { %p2884_p2 = pnand %p2882_p0, %p3379_p6  ;;  %p2889_p5 = por %p2888_p3, %p2887_p1 }
  0x4d   : > { %p2885_p13 = pneg %p2884_p2  ;;  %p2891_p9 = por %p2890_p7, %p2889_p5 }
  0x4f   : > { %p2892_p10 = pnand %p2891_p9, %p2885_p13 }
  0x51   : > { %2895 = shalt.err (!%p2892_p10)
}
  0x52   : > { %s2896_s1 = scalar_lea.vmem %s549_s5, 16  ;;  %s3202_s11 = smov [#allocation8]  }
  0x53   : > { %p2897_p8 = scmp.ne.s32.totalorder %s549_s5, %s2896_s1  ;;  %s2901_s20 = sshll.u32 %s3202_s11, 4  ;;  %s2902_s20 = int_to_ptr.vmem [resolvable:$false] %s2901_s20 }
  0x54   : > { %s2903_s2 = scalar_lea.vmem %s2902_s20, 32  ;;  %p2904_p2 = scmp.lt.s32.totalorder %s549_s5, %s2902_s20 }
  0x55   : > { %p2899_p11 = pnand %p2897_p8, %p3379_p6  ;;  %p2905_p12 = scmp.lt.s32.totalorder %s2903_s2, %s2896_s1 }
  0x57   : > { %p2900_p0 = pneg %p2899_p11  ;;  %p2906_p4 = por %p2905_p12, %p2904_p2 }
  0x59   : > { %p2907_p1 = pnand %p2906_p4, %p2900_p0 }
  0x5b   : > { %2910 = shalt.err (!%p2907_p1)
}
  0x5c   : > { %p4055_p3 = scmp.ne.s32.totalorder %s4047_s27, 0  ;;  %s3439_s20 = sadd.s32 4294967295, %s3197_s23  }
  0x5d   : > { %s2321_s8 = sadd.s32 4294967294, %s3197_s23   ;;  %s52_s24 = sadd.s32 1, %s3189_s21 }
  0x5e   : > { %2610 = dma.hbm_to_vmem [thread:$0]  (!%p4055_p3), %s3413_s26, 16, %s549_s5, %s3418_s14  }
  0x5f   : > { %p53_p4 = scmp.ge.s32.totalorder %s52_s24, 2  ;;  %s55_s19 = sadd.s32 1, %s3193_s22 }
  0x60   : > { %s64_s12 = sadd.s32 1, %s3177_s18  ;;  %p71_p12 = scmp.ne.s32.totalorder %s3177_s18, %s3173_s17 }
  0x61   : > { %s4104_s24 = smov (%p53_p4, %s52_s24), 0  ;;  %s4106_s19 = smov (!%p53_p4, %s55_s19), %s3193_s22 }
  0x62   : > { %4056 = sst [smem:[#allocation28_spill]] %s4104_s24  ;;  %s60_s5 = ssub.s32 %s3189_s21, %s4104_s24 }
  0x63   : > { %p4057_p13 = scmp.eq.s32.totalorder %s3197_s23, 0  ;;  %p57_p7 = scmp.ge.s32.totalorder %s4106_s19, 2 }
  0x64   : > { %p77_p9 = scmp.ne.s32.totalorder %s3173_s17, %s3169_s16  ;;  %p78_p10 = scmp.eq.s32.totalorder %s3439_s20, 0 }
  0x65   : > { %p3457_p5 = por %p4057_p13, %p71_p12  ;;  %s90_s13 = sadd.s32 1, %s3165_s15 }
  0x66   : > { %s4108_s19 = smov (%p57_p7, %s4106_s19), 0  ;;  %p3470_p8 = por %p78_p10, %p77_p9 }
  0x67   : > { %4059 = sst [smem:[#allocation29_spill]] %s4108_s19  ;;  %p103_p11 = scmp.ne.s32.totalorder %s3161_s30, %s3157_s29 }
  0x68   : > { %s4060_s1 = scalar_select %p3470_p8, 1, 0 }
  0x69   : > { %s59_s11 = ssub.s32 %s3193_s22, %s4108_s19  ;;  %p415_p0 = scmp.eq.s32.totalorder %s3439_s20, 3 }
  0x6a   : > { %s61_s2 = sor.u32 %s60_s5, %s59_s11  ;;  %p88_p2 = scmp.eq.s32.totalorder %s59_s11, 0 }
  0x6b   : > { %p62_p1 = scmp.eq.s32.totalorder %s61_s2, 0  ;;  %p3479_p4 = por %p103_p11, %p78_p10 }
  0x6c   : > { %s3484_s24 = scalar_select %p88_p2, %s3165_s15, %s90_s13  }
  0x6d   : > { %s4061_s4 = scalar_select %p3479_p4, 1, 0 }
  0x6e   : > { %4063 = sst [smem:[#allocation31_spill]] %s3484_s24  ;;  %p3492_p13 = por %p415_p0, %p71_p12 }
  0x6f   : > { %4062 = sst [smem:[#allocation30_spill]] %s4061_s4  ;;  %p421_p7 = scmp.eq.s32.totalorder %s2321_s8, 3 }
  0x70   : > { %s3487_s28 = scalar_select %p62_p1, %s3177_s18, %s64_s12  }
  0x71   : > { %s4065_s29 = scalar_select %p3492_p13, 1, 0 }
  0x72   : > { %4064 = sst [smem:[#allocation32_spill]] %s3487_s28  ;;  %s469_s5 = sand.u32 1, %s3177_s18  }
  0x73   : > { %s2325_s11 = sshll.u32 %s3193_s22, 1  ;;  %p3501_p8 = por %p421_p7, %p77_p9 }
  0x74   : > { %s2324_s19 = sshll.u32 %s469_s5, 3  ;;  %s478_s4 = sadd.s32 %s3189_s21, %s2325_s11 }
  0x75   : > { %s4066_s2 = scalar_select %p3501_p8, 1, 0 }
  0x76   : > { %s2326_s13 = sshll.u32 %s478_s4, 7  ;;  %s473_s28 = scalar_lea.vmem [#allocation2], %s2324_s19 }
  0x77   : > { %s3509_s12 = scalar_lea.hbm %s3997_s0, %s2326_s13  ;;  %s482_s8 = sshll.u32 %s473_s28, 4  ;;  %s3511_s8 = int_to_ptr.vmem [resolvable:$true] %s482_s8 }
  0x78   : > { %p4067_p12 = scmp.lt.s32.totalorder %s3197_s23, 4  ;;  %s2328_s4 = sshll.u32 %s3354_s25, 6 }
  0x79   : > { %s2457_s15 = sshll.u32 %s3193_s22, 10  ;;  %s470_s24 = scalar_lea.sflag [#allocation3], %s469_s5 }
  0x7a   : > { %p3517_p9 = pnand %p4067_p12, %p3457_p5  ;;  %s2911_s11 = scalar_lea.hbm %s3509_s12, 128 }
  0x7b   : > { %p2912_p10 = scmp.ne.s32.totalorder %s3509_s12, %s2911_s11  ;;  %s2916_s26 = scalar_lea.hbm %s3997_s0, 512 }
  0x7c   : > { %p2913_p11 = pneg %p3517_p9  ;;  %p2917_p5 = scmp.lt.u32.totalorder %s3509_s12, %s3997_s0 }
  0x7d   : > { %p2918_p1 = scmp.lt.u32.totalorder %s2916_s26, %s2911_s11  ;;  %p2920_p12 = scmp.lt.u32.totalorder %s2911_s11, %s3509_s12 }
  0x7e   : > { %p2914_p0 = pnand %p2913_p11, %p2912_p10 }
  0x7f   : > { %p2919_p7 = por %p2918_p1, %p2917_p5 }
  0x80   : > { %p2915_p2 = pneg %p2914_p0 }
  0x81   : > { %p2921_p8 = por %p2920_p12, %p2919_p7 }
  0x83   : > { %p2922_p13 = pnand %p2921_p8, %p2915_p2 }
  0x85   : > { %2925 = shalt.err (!%p2922_p13)
}
  0x86   : > { %s2926_s5 = scalar_lea.vmem %s3511_s8, 128  ;;  %s3203_s28 = smov [#allocation2]  }
  0x87   : > { %p2927_p10 = scmp.ne.s32.totalorder %s3511_s8, %s2926_s5  ;;  %s2931_s19 = sshll.u32 %s3203_s28, 4  ;;  %s2932_s19 = int_to_ptr.vmem [resolvable:$false] %s2931_s19 }
  0x88   : > { %s2933_s21 = scalar_lea.vmem %s2932_s19, 256  ;;  %p2934_p3 = scmp.lt.s32.totalorder %s3511_s8, %s2932_s19 }
  0x89   : > { %p2929_p0 = pnand %p2927_p10, %p2913_p11  ;;  %p2935_p5 = scmp.lt.s32.totalorder %s2933_s21, %s2926_s5 }
  0x8b   : > { %p2930_p4 = pneg %p2929_p0  ;;  %p2936_p1 = por %p2935_p5, %p2934_p3 }
  0x8d   : > { %p2937_p7 = pnand %p2936_p1, %p2930_p4 }
  0x8f   : > { %2940 = shalt.err (!%p2937_p7)
}
  0x90   : > { %2601 = dma.hbm_to_vmem [thread:$0]  (!%p3517_p9), %s3509_s12, 128, %s3511_s8, %s470_s24  }
  0x91   : > { %s3553_s13 = scalar_lea.hbm %s4000_s3, %s2457_s15  ;;  %s521_s5 = scalar_lea.vmem [#allocation7], %s2328_s4 }
  0x92   : > { %s528_s18 = sshll.u32 %s521_s5, 4  ;;  %s2332_s28 = sshll.u32 %s3354_s25, 8  ;;  %s3557_s18 = int_to_ptr.vmem [resolvable:$true] %s528_s18 }
  0x93   : > { %s2941_s19 = scalar_lea.hbm %s3553_s13, 1024  ;;  %s2946_s15 = scalar_lea.hbm %s4000_s3, 2048 }
  0x94   : > { %p2942_p3 = scmp.ne.s32.totalorder %s3553_s13, %s2941_s19  ;;  %p2947_p13 = scmp.lt.u32.totalorder %s3553_s13, %s4000_s3 }
  0x95   : > { %p2948_p9 = scmp.lt.u32.totalorder %s2946_s15, %s2941_s19  ;;  %p2950_p2 = scmp.lt.u32.totalorder %s2941_s19, %s3553_s13 }
  0x96   : > { %p2944_p8 = pnand %p2942_p3, %p3379_p6 }
  0x97   : > { %p2949_p11 = por %p2948_p9, %p2947_p13 }
  0x98   : > { %p2945_p4 = pneg %p2944_p8 }
  0x99   : > { %p2951_p12 = por %p2950_p2, %p2949_p11 }
  0x9b   : > { %p2952_p10 = pnand %p2951_p12, %p2945_p4 }
  0x9d   : > { %2955 = shalt.err (!%p2952_p10)
}
  0x9e   : > { %s2956_s4 = scalar_lea.vmem %s3557_s18, 1024  ;;  %s3204_s11 = smov [#allocation7]  }
  0x9f   : > { %p2957_p0 = scmp.ne.s32.totalorder %s3557_s18, %s2956_s4  ;;  %s2961_s26 = sshll.u32 %s3204_s11, 4  ;;  %s2962_s26 = int_to_ptr.vmem [resolvable:$false] %s2961_s26 }
  0xa0   : > { %s2963_s5 = scalar_lea.vmem %s2962_s26, 2048  ;;  %p2964_p7 = scmp.lt.s32.totalorder %s3557_s18, %s2962_s26 }
  0xa1   : > { %p2959_p5 = pnand %p2957_p0, %p3379_p6  ;;  %p2965_p3 = scmp.lt.s32.totalorder %s2963_s5, %s2956_s4 }
  0xa3   : > { %p2960_p1 = pneg %p2959_p5  ;;  %p2966_p8 = por %p2965_p3, %p2964_p7 }
  0xa5   : > { %p2967_p13 = pnand %p2966_p8, %p2960_p1 }
  0xa7   : > { %2970 = shalt.err (!%p2967_p13)
}
  0xa8   : > { %s4030_s19 = smov 64   ;;  %s3206_s12 = smov 4  }
  0xa9   : > { %p4069_p4 = scmp.ne.s32.totalorder %s4047_s27, 0  ;;  %s2458_s8 = sshll.u32 %s3193_s22, 12 }
  0xaa   : > { %s3591_s21 = scalar_lea.hbm %s4004_s7, %s2458_s8  ;;  %s571_s4 = scalar_lea.vmem [#allocation10], %s2332_s28 }
  0xab   : > { %2607 = dma.hbm_to_vmem [thread:$0]  (!%p4069_p4), %s3553_s13, 1024, %s3557_s18, %s3373_s10, %s4030_s19, %s4030_s19, %s3206_s12  }
  0xac   : > { %s578_s11 = sshll.u32 %s571_s4, 4  ;;  %s2971_s26 = scalar_lea.hbm %s3591_s21, 4096  ;;  %s3595_s11 = int_to_ptr.vmem [resolvable:$true] %s578_s11 }
  0xad   : > { %p2972_p9 = scmp.ne.s32.totalorder %s3591_s21, %s2971_s26  ;;  %s2976_s18 = scalar_lea.hbm %s4004_s7, 8192 }
  0xae   : > { %p2977_p12 = scmp.lt.u32.totalorder %s3591_s21, %s4004_s7  ;;  %p2978_p10 = scmp.lt.u32.totalorder %s2976_s18, %s2971_s26 }
  0xaf   : > { %p2974_p11 = pnand %p2972_p9, %p3379_p6  ;;  %p2980_p5 = scmp.lt.u32.totalorder %s2971_s26, %s3591_s21 }
  0xb0   : > { %p2979_p0 = por %p2978_p10, %p2977_p12 }
  0xb1   : > { %p2975_p2 = pneg %p2974_p11 }
  0xb2   : > { %p2981_p1 = por %p2980_p5, %p2979_p0 }
  0xb4   : > { %p2982_p7 = pnand %p2981_p1, %p2975_p2 }
  0xb6   : > { %2985 = shalt.err (!%p2982_p7)
}
  0xb7   : > { %s2986_s24 = scalar_lea.vmem %s3595_s11, 4096  ;;  %s3207_s4 = smov [#allocation10]  }
  0xb8   : > { %p2987_p3 = scmp.ne.s32.totalorder %s3595_s11, %s2986_s24  ;;  %s2991_s10 = sshll.u32 %s3207_s4, 4  ;;  %s2992_s10 = int_to_ptr.vmem [resolvable:$false] %s2991_s10 }
  0xb9   : > { %s2993_s13 = scalar_lea.vmem %s2992_s10, 8192  ;;  %p2994_p9 = scmp.lt.s32.totalorder %s3595_s11, %s2992_s10 }
  0xba   : > { %p2989_p8 = pnand %p2987_p3, %p3379_p6  ;;  %p2995_p11 = scmp.lt.s32.totalorder %s2993_s13, %s2986_s24 }
  0xbc   : > { %p2990_p13 = pneg %p2989_p8  ;;  %p2996_p12 = por %p2995_p11, %p2994_p9 }
  0xbe   : > { %p2997_p10 = pnand %p2996_p12, %p2990_p13 }
  0xc0   : > { %3000 = shalt.err (!%p2997_p10)
}
  0xc1   : > { %s3208_s26 = smov 256   ;;  %s3209_s18 = smov 16  }
  0xc2   : > { %2613 = dma.hbm_to_vmem [thread:$0]  (!%p4069_p4), %s3591_s21, 4096, %s3595_s11, %s3418_s14, %s3208_s26, %s3208_s26, %s3209_s18  }
  0xc3   : > { %s3624_s24 = scalar_lea.hbm %s4006_s9, %s2458_s8  ;;  %s599_s4 = scalar_lea.vmem [#allocation11], %s2332_s28 }
  0xc4   : > { %s606_s10 = sshll.u32 %s599_s4, 4  ;;  %s596_s13 = scalar_lea.sflag [#allocation12], %s3354_s25  ;;  %s3628_s10 = int_to_ptr.vmem [resolvable:$true] %s606_s10 }
  0xc5   : > { %s3001_s19 = scalar_lea.hbm %s3624_s24, 4096  ;;  %s3006_s8 = scalar_lea.hbm %s4006_s9, 8192 }
  0xc6   : > { %p3002_p2 = scmp.ne.s32.totalorder %s3624_s24, %s3001_s19  ;;  %p3007_p1 = scmp.lt.u32.totalorder %s3624_s24, %s4006_s9 }
  0xc7   : > { %p3008_p7 = scmp.lt.u32.totalorder %s3006_s8, %s3001_s19  ;;  %p3010_p8 = scmp.lt.u32.totalorder %s3001_s19, %s3624_s24 }
  0xc8   : > { %p3004_p0 = pnand %p3002_p2, %p3379_p6 }
  0xc9   : > { %p3009_p3 = por %p3008_p7, %p3007_p1 }
  0xca   : > { %p3005_p5 = pneg %p3004_p0 }
  0xcb   : > { %p3011_p13 = por %p3010_p8, %p3009_p3 }
  0xcd   : > { %p3012_p9 = pnand %p3011_p13, %p3005_p5 }
  0xcf   : > { %3015 = shalt.err (!%p3012_p9)
}
  0xd0   : > { %s3016_s28 = scalar_lea.vmem %s3628_s10, 4096  ;;  %s3210_s18 = smov [#allocation11]  }
  0xd1   : > { %p3017_p11 = scmp.ne.s32.totalorder %s3628_s10, %s3016_s28  ;;  %s3021_s5 = sshll.u32 %s3210_s18, 4  ;;  %s3022_s5 = int_to_ptr.vmem [resolvable:$false] %s3021_s5 }
  0xd2   : > { %s3023_s15 = scalar_lea.vmem %s3022_s5, 8192  ;;  %p3024_p2 = scmp.lt.s32.totalorder %s3628_s10, %s3022_s5 }
  0xd3   : > { %p3019_p12 = pnand %p3017_p11, %p3379_p6  ;;  %p3025_p0 = scmp.lt.s32.totalorder %s3023_s15, %s3016_s28 }
  0xd5   : > { %p3020_p10 = pneg %p3019_p12  ;;  %p3026_p1 = por %p3025_p0, %p3024_p2 }
  0xd7   : > { %p3027_p7 = pnand %p3026_p1, %p3020_p10 }
  0xd9   : > { %3030 = shalt.err (!%p3027_p7)
}
  0xda   : > { %s4070_s19 = smov 64   ;;  %s4071_s6 = sld [smem:[#allocation27_spill]] }
  0xdb   : > { %2616 = dma.hbm_to_vmem [thread:$0]  (!%p4069_p4), %s3624_s24, 4096, %s3628_s10, %s596_s13, %s4070_s19, %s4070_s19, %s3206_s12  }
  0xe0   : > { %p4072_p6 = scmp.ne.s32.totalorder %s4071_s6, 0 }
  0xe1   : > { %s3660_s4 = sand.u32 (!%p4072_p6), 1, %s3173_s17   ;;  %p4073_p5 = scmp.ne.s32.totalorder (!%p4072_p6), %s4060_s1, 0 }
  0xe2   : > { %636 = sbr.rel (%p4072_p6) target bundleno = 2544 (0x9f0), region = 72  ;;  %s3663_s14 = sshll.u32 (!%p4072_p6), %s3660_s4, 3 }
  0xe3   : > { %s639_s27 = scalar_lea.sflag (!%p4072_p6), [#allocation3], %s3660_s4  ;;  %s642_s21 = scalar_lea.vmem (!%p4072_p6), [#allocation2], %s3663_s14 }
  0xe9   : > { %3132 = dma.done.wait (%p4073_p5), %s639_s27, 128  }
  0xea   : > { %3134 = vsyncadd (%p4073_p5), %s639_s27, 4294967168  ;;  %s4074_s25 = sld [smem:[#allocation30_spill]]  ;;  %s647_s12 = sand.u32 1, %s3439_s20  }
  0xeb   : > { %s3673_s24 = sand.u32 1, %s3161_s30   ;;  %s648_s13 = scalar_lea.sflag [#allocation6], %s647_s12 }
  0xec   : > { %s2580_s10 = smul.u32 192, %s3673_s24 }
  0xee   : > { %s3676_s8 = scalar_lea.vmem [#allocation5], %s2580_s10 }
  0xf0   : > { %p4075_p4 = scmp.ne.s32.totalorder %s4074_s25, 0 }
  0xf2   : > { %3136 = dma.done.wait (%p4075_p4), %s648_s13, 4096  }
  0xf3   : > { %3138 = vsyncadd (%p4075_p4), %s648_s13, 4294963200  ;;  %s2340_s1 = sshll.u32 %s3673_s24, 6  ;;  %s666_s26 = scalar_lea.sflag [#allocation9], %s647_s12 }
  0xf4   : > { %s3683_s11 = scalar_lea.vmem [#allocation7], %s2340_s1  ;;  %s668_s20 = scalar_lea.vmem [#allocation8], %s3673_s24 }
  0xf5   : > { %3140 = dma.done.wait (%p4075_p4), %s666_s26, 4112  }
  0xf6   : > { %3142 = vsyncadd (%p4075_p4), %s666_s26, 4294963184  ;;  %s2341_s28 = sshll.u32 %s3673_s24, 8  ;;  %s683_s5 = scalar_lea.sflag [#allocation12], %s3673_s24 }
  0xf7   : > { %s3691_s18 = scalar_lea.vmem [#allocation10], %s2341_s28  ;;  %s3694_s15 = scalar_lea.vmem [#allocation11], %s2341_s28 }
  0xf8   : > { %3144 = dma.done.wait (%p4075_p4), %s683_s5, 4096  }
  0xf9   : > { %3146 = vsyncadd (%p4075_p4), %s683_s5, 4294963200  ;;  %v3211_v0 = vmov 0   ;;  %v3212_v1 = vmov 0.0   ;;  %v2723_v2 = vld [vmem:[%s3676_s8 + $0x4] ss:$12 sps:$4 sm:$0xff]   ;;  %s4076_s19 = sld [smem:[#allocation25_spill]]  ;;  %v843_v28 = vlaneseq }
  0xfa   : > { %1018 = vmatprep.mubr.bf16.mxu0 %v3211_v0  ;;  %2526 = vmatprep.subr.bf16.mxu1 %v3212_v1  ;;  %v2725_v3 = vld [vmem:[%s3676_s8] ss:$12 sps:$4 sm:$0xff]   ;;  %v2726_v4 = vld [vmem:[%s3676_s8 + $0x1c] ss:$12 sps:$4 sm:$0xff]   ;;  %v2728_v5 = vld [vmem:[%s3676_s8 + $0x18] ss:$12 sps:$4 sm:$0xff]  }
  0xfb   : > { %986 = vmatprep.subr.bf16.mxu0 %v2723_v2  ;;  %v2729_v6 = vld [vmem:[%s3676_s8 + $0x34] ss:$12 sps:$4 sm:$0xff]   ;;  %v2731_v7 = vld [vmem:[%s3676_s8 + $0x30] ss:$12 sps:$4 sm:$0xff]   ;;  %v2732_v8 = vld [vmem:[%s3676_s8 + $0x4c] ss:$12 sps:$4 sm:$0xff]  }
  0xfc   : > { %987 = vmatpush1.bf16.msra.mxu0 %v2725_v3  ;;  %v2734_v9 = vld [vmem:[%s3676_s8 + $0x48] ss:$12 sps:$4 sm:$0xff]   ;;  %v2735_v11 = vld [vmem:[%s3676_s8 + $0x64] ss:$12 sps:$4 sm:$0xff]   ;;  %v2748_v12 = vld [vmem:[%s3676_s8 + $0x20] ss:$12 sps:$4 sm:$0xff]  }
  0xfd   : > { %988 = vmatprep.subr.bf16.mxu0 %v2726_v4  ;;  %v2747_v10 = vld [vmem:[%s3676_s8 + $0x8] ss:$12 sps:$4 sm:$0xff]   ;;  %v2737_v13 = vld [vmem:[%s3676_s8 + $0x60] ss:$12 sps:$4 sm:$0xff]   ;;  %v2740_v15 = vld [vmem:[%s3676_s8 + $0x78] ss:$12 sps:$4 sm:$0xff]  }
  0xfe   : > { %2527 = vmatpush3.bf16.msra.mxu1 %v2747_v10  ;;  %v2738_v14 = vld [vmem:[%s3676_s8 + $0x7c] ss:$12 sps:$4 sm:$0xff]   ;;  %v2749_v16 = vld [vmem:[%s3676_s8 + $0x38] ss:$12 sps:$4 sm:$0xff]   ;;  %v2741_v17 = vld [vmem:[%s3676_s8 + $0x94] ss:$12 sps:$4 sm:$0xff]  }
  0xff   : > { %2528 = vmatprep.subr.bf16.mxu1 %v3212_v1  ;;  %v2750_v18 = vld [vmem:[%s3676_s8 + $0x50] ss:$12 sps:$4 sm:$0xff]   ;;  %v2744_v20 = vld [vmem:[%s3676_s8 + $0xac] ss:$12 sps:$4 sm:$0xff]   ;;  %v2751_v21 = vld [vmem:[%s3676_s8 + $0x68] ss:$12 sps:$4 sm:$0xff]  }
 0x100   : > { %989 = vmatpush1.bf16.msra.mxu0 %v2728_v5  ;;  %v2743_v19 = vld [vmem:[%s3676_s8 + $0x90] ss:$12 sps:$4 sm:$0xff]   ;;  %v2746_v22 = vld [vmem:[%s3676_s8 + $0xa8] ss:$12 sps:$4 sm:$0xff]   ;;  %v2752_v24 = vld [vmem:[%s3676_s8 + $0x80] ss:$12 sps:$4 sm:$0xff]  }
 0x101   : > { %990 = vmatprep.subr.bf16.mxu0 %v2729_v6  ;;  %v3728_v23 = vld [vmem:[%s642_s21] sm:$0xff]  ;;  %vm3213_vm0 = vmmov 0   ;;  %p783_p3 = scmp.lt.s32.totalorder %s4076_s19, 1  ;;  %v3752_v29 = vshrl.u32 %v843_v28, 7  ;;  %s4077_s12 = sld [smem:[#allocation34_spill]]  ;;  %vm1127_vm1 = vcmask 1043456  }
 0x102   : > { %2529 = vmatpush3.bf16.msra.mxu1 %v2748_v12  ;;  %v808_v25 = vpack.c.bf16 %v3728_v23, %v3728_v23  ;;  %v2753_v26 = vld [vmem:[%s3676_s8 + $0x98] ss:$12 sps:$4 sm:$0xff]   ;;  %v2754_v27 = vld [vmem:[%s3676_s8 + $0xb0] ss:$12 sps:$4 sm:$0xff]   ;;  %2542 = vmatprep.mubr.msk.bf16.mxu1 %vm3213_vm0, %v3212_v1  ;;  %vm1111_vm2 = vcmask 64512   ;;  %v2756_v2 = vld [vmem:[%s3683_s11 + $0x8] sm:$0xff]  }
 0x103   : > { %2530 = vmatprep.subr.bf16.mxu1 %v3212_v1  ;;  %s3749_s6 = scalar_select %p783_p3, %s4076_s19, 1  ;;  %v849_v30 = vsub.s32 1, %v3752_v29  ;;  %v845_v32 = vsub.s32 0, %v3752_v29  ;;  %v853_v44 = vsub.s32 2, %v3752_v29  ;;  %v2755_v63 = vld [vmem:[%s3683_s11] sm:$0xff]   ;;  %v2757_v3 = vld [vmem:[%s3683_s11 + $0x10] sm:$0xff]  }
 0x104   : > { %991 = vmatpush1.bf16.msra.mxu0 %v2731_v7  ;;  %v2758_v4 = vld [vmem:[%s3683_s11 + $0x18] sm:$0xff]   ;;  %v2759_v5 = vld [vmem:[%s3683_s11 + $0x20] sm:$0xff]   ;;  %v2760_v6 = vld [vmem:[%s3683_s11 + $0x28] sm:$0xff]   ;;  %s782_s13 = scalar_lea.vmem [#allocation14], %s3663_s14  ;;  %s4078_s1 = sld [smem:[#allocation36_spill]] }
 0x105   : > { %992 = vmatprep.subr.bf16.mxu0 %v2732_v8  ;;  %s2581_s27 = smul.u32 3, %s3749_s6  ;;  %v2761_v7 = vld [vmem:[%s3683_s11 + $0x30] sm:$0xff]   ;;  %v2762_v12 = vld [vmem:[%s3683_s11 + $0x38] sm:$0xff]   ;;  %s4079_s28 = sld [smem:[#allocation37_spill]] }
 0x106   : > { %2531 = vmatpush3.bf16.msra.mxu1 %v2749_v16  ;;  %v2768_v28 = vld [vmem:[%s3691_s18 + $0xc] ss:$16 sps:$4 sm:$0xff]   ;;  %s2345_s5 = sshll.u32 %s3749_s6, 2  ;;  %s4080_s25 = sld [smem:[#allocation38_spill]] }
 0x107   : > { %2532 = vmatprep.subr.bf16.mxu1 %v3212_v1  ;;  %s786_s10 = scalar_lea.vmem %s4077_s12, %s2581_s27  ;;  %s4081_s24 = sld [smem:[#allocation39_spill]] }
 0x108   : > { %993 = vmatpush1.bf16.msra.mxu0 %v2734_v9  ;;  %v841_v31 = vld [vmem:[%s786_s10] sm:$0x7]  ;;  %s2026_s21 = sshll.u32 %s782_s13, 4  ;;  %p4084_p13 = scmp.ne.s32.totalorder %s4065_s29, 0  ;;  %s2027_s21 = int_to_ptr.vmem [resolvable:$true] %s2026_s21 }
 0x109   : > { %994 = vmatprep.subr.bf16.mxu0 %v2735_v11  ;;  %v850_v33 = vrot.slane %v841_v31, %v849_v30  ;;  %v846_v34 = vrot.slane %v841_v31, %v845_v32  ;;  %v854_v45 = vrot.slane %v841_v31, %v853_v44  ;;  %v2774_v31 = vld [vmem:[%s3691_s18 + $0x2c] ss:$16 sps:$4 sm:$0xff]  }
 0x10a   : > { %2533 = vmatpush3.bf16.msra.mxu1 %v2750_v18  ;;  %s789_s11 = scalar_lea.vmem %s4078_s1, %s3749_s6  ;;  %s4082_s1 = sld [smem:[#allocation24_spill]] }
 0x10b   : > { %2534 = vmatprep.subr.bf16.mxu1 %v3212_v1 }
 0x10c   : > { %995 = vmatpush1.bf16.msra.mxu0 %v2737_v13  ;;  %s796_s12 = scalar_lea.vmem %s4080_s25, %s2345_s5  ;;  %s4083_s5 = sld [smem:[#allocation43_spill]] }
 0x10d   : > { %996 = vmatprep.subr.bf16.mxu0 %v2738_v14  ;;  %s799_s8 = scalar_lea.vmem %s4081_s24, %s3749_s6  ;;  %s1996_s25 = scalar_lea.sflag [#allocation15], %s3660_s4 }
 0x10e   : > { %2535 = vmatpush3.bf16.msra.mxu1 %v2751_v21 }
 0x10f   : > { %2536 = vmatprep.subr.bf16.mxu1 %v3212_v1 }
 0x110   : > { %997 = vmatpush1.bf16.msra.mxu0 %v2740_v15 }
 0x111   : > { %998 = vmatprep.subr.bf16.mxu0 %v2741_v17  ;;  %v2371_v17 = vld [vmem:[%s668_s20] ss:$0 sm:$0xff] }
 0x112   : > { %2537 = vmatpush3.bf16.msra.mxu1 %v2752_v24 }
 0x113   : > { %2538 = vmatprep.subr.bf16.mxu1 %v3212_v1 }
 0x114   : > { %999 = vmatpush1.bf16.msra.mxu0 %v2743_v19 }
 0x115   : > { %1000 = vmatprep.subr.bf16.mxu0 %v2744_v20 }
 0x116   : > { %2539 = vmatpush3.bf16.msra.mxu1 %v2753_v26  ;;  %v2765_v26 = vld [vmem:[%s3691_s18 + $0x4] ss:$16 sps:$4 sm:$0xff]  }
 0x117   : > { %2540 = vmatprep.subr.bf16.mxu1 %v3212_v1 }
 0x118   : > { %1001 = vmatpush1.bf16.msra.mxu0 %v2746_v22 }
 0x119   : > { %2558 = vmatprep.subr.bf16.mxu0 %v3212_v1 }
 0x11a   : > { %2541 = vmatpush3.bf16.msra.mxu1 %v2754_v27  ;;  %v2766_v27 = vld [vmem:[%s3691_s18 + $0x8] ss:$16 sps:$4 sm:$0xff]  }
 0x11b   : > { %1019 = vmatmul.mubr.bf16.vlgmr.msra.gmra.mrb[0].mxu0 %v808_v25  ;;  %2546 = vmatprep.subr.bf16.mxu1 %v3212_v1 }
 0x11c   : > { %2574 = vmatprep.mubr.msk.bf16.mxu0 %vm3213_vm0, %v3212_v1  ;;  %2559 = vmatpush3.bf16.msra.mxu0 %v2755_v63  ;;  %v2811_v63 = vld [vmem:[%s3694_s15 + $0x40] sm:$0xff]  }
 0x11d   : > { %2543 = vmatmul.mubr.bf16.vlgmr.msra.gmra.mrb[0].mxu1 %v808_v25  ;;  %2560 = vmatprep.subr.bf16.mxu0 %v3212_v1  ;;  %v2763_v25 = vld [vmem:[%s3691_s18] ss:$16 sps:$4 sm:$0xff]  }
 0x11e   : > { %2548 = vmatprep.mubr.msk.bf16.mxu1 %vm3213_vm0, %v3212_v1 }
 0x120   : > { %2561 = vmatpush3.bf16.msra.mxu0 %v2756_v2  ;;  %v2812_v2 = vld [vmem:[%s3694_s15 + $0xc0] sm:$0xff]  }
 0x121   : > { %2562 = vmatprep.subr.bf16.mxu0 %v3212_v1 }
 0x124   : > { %2563 = vmatpush3.bf16.msra.mxu0 %v2757_v3 }
 0x125   : > { %2564 = vmatprep.subr.bf16.mxu0 %v3212_v1 }
 0x128   : > { %2565 = vmatpush3.bf16.msra.mxu0 %v2758_v4 }
 0x129   : > { %2566 = vmatprep.subr.bf16.mxu0 %v3212_v1 }
 0x12c   : > { %2567 = vmatpush3.bf16.msra.mxu0 %v2759_v5 }
 0x12d   : > { %2568 = vmatprep.subr.bf16.mxu0 %v3212_v1 }
 0x130   : > { %2569 = vmatpush3.bf16.msra.mxu0 %v2760_v6 }
 0x131   : > { %2570 = vmatprep.subr.bf16.mxu0 %v3212_v1 }
 0x134   : > { %2571 = vmatpush3.bf16.msra.mxu0 %v2761_v7  ;;  %v2380_v7 = vld [vmem:[%s789_s11] ss:$0 sm:$0xff]  ;;  %s2451_s11 = sshll.u32 %s4076_s19, 1  ;;  %s3214_s19 = smov [#allocation14]  }
 0x135   : > { %2572 = vmatprep.subr.bf16.mxu0 %v3212_v1  ;;  %s3890_s26 = sadd.s32 %s4082_s1, %s2451_s11 }
 0x136   : > { %s2452_s20 = sshll.u32 %s3890_s26, 7 }
 0x137   : > { %s3898_s27 = scalar_lea.hbm %s4083_s5, %s2452_s20 }
 0x138   : > { %2573 = vmatpush3.bf16.msra.mxu0 %v2762_v12  ;;  %v2813_v12 = vld [vmem:[%s3694_s15] sm:$0xff]  }
 0x139   : > { %1568 = vmatprep.subr.bf16.mxu0 %v2768_v28  ;;  %v2828_v28 = vld [vmem:[%s3694_s15 + $0xe0] sm:$0xff]  }
 0x1ee   : > { %v1020_v35 = vpop.f32.mrb[0].mxu0 }
 0x1ef   : > { %v1022_v36 = vpop.f32.mrb[1].mxu0  ;;  %v1021_v39 = vadd.f32 %v1020_v35, %v846_v34  ;;  %v2772_v34 = vld [vmem:[%s3691_s18 + $0x28] ss:$16 sps:$4 sm:$0xff]   ;;  %v2777_v35 = vld [vmem:[%s3691_s18 + $0x44] ss:$16 sps:$4 sm:$0xff]  }
 0x1f0   : > { %v1023_v37 = vadd.f32 %v1022_v36, %v850_v33  ;;  %v1024_v38 = vpop.f32.mrb[2].mxu0  ;;  %v1061_v46 = vpop.f32.mrb[0].mxu1  ;;  %v2769_v33 = vld [vmem:[%s3691_s18 + $0x20] ss:$16 sps:$4 sm:$0xff]  }
 0x1f1   : > { %v1025_v40 = vpop.f32.mrb[3].mxu0  ;;  %v1067_v42 = vmul.f32 0.088388346, %v1021_v39  ;;  %v1062_v47 = vadd.f32 %v1061_v46, %v854_v45  ;;  %v2544_v48 = vpop.f32.mrb[1].mxu1  ;;  %v2775_v36 = vld [vmem:[%s3691_s18 + $0x40] ss:$16 sps:$4 sm:$0xff]  }
 0x1f2   : > { %v1069_v41 = vpack.c.bf16 %v1023_v37, %v1023_v37  ;;  %v1064_v49 = vpop.f32.mrb[2].mxu1  ;;  %v2778_v37 = vld [vmem:[%s3691_s18 + $0x48] ss:$16 sps:$4 sm:$0xff]   ;;  %v2781_v45 = vld [vmem:[%s3691_s18 + $0x60] ss:$16 sps:$4 sm:$0xff]  }
 0x1f3   : > { %v1068_v43 = vpack.c.bf16 %v1067_v42, %v1067_v42  ;;  %v1070_v50 = vpack.c.bf16 %v1062_v47, %v1062_v47  ;;  %v2545_v51 = vpop.f32.mrb[3].mxu1  ;;  %v2783_v42 = vld [vmem:[%s3691_s18 + $0x64] ss:$16 sps:$4 sm:$0xff]   ;;  %v2784_v46 = vld [vmem:[%s3691_s18 + $0x68] ss:$16 sps:$4 sm:$0xff]  }
 0x1f4   : > { %2547 = vmatpush3.bf16.xpose.msra.mxu1 %v1069_v41  ;;  %v2789_v47 = vld [vmem:[%s3691_s18 + $0x84] ss:$16 sps:$4 sm:$0xff]   ;;  %v2792_v48 = vld [vmem:[%s3691_s18 + $0x8c] ss:$16 sps:$4 sm:$0xff]   ;;  %v2787_v49 = vld [vmem:[%s3691_s18 + $0x80] ss:$16 sps:$4 sm:$0xff]  }
 0x1f5   : > { %2552 = vmatprep.subr.bf16.mxu1 %v3212_v1  ;;  %v1129_v52 = vsel %vm1127_vm1, %v1070_v50, 0  ;;  %v2790_v50 = vld [vmem:[%s3691_s18 + $0x88] ss:$16 sps:$4 sm:$0xff]   ;;  %v2795_v51 = vld [vmem:[%s3691_s18 + $0xa4] ss:$16 sps:$4 sm:$0xff]  }
 0x1fb   : > { %2549 = vmatmul.mubr.bf16.vlgmr.msra.gmra.mrb[4].mxu1 %v1068_v43  ;;  %v2786_v43 = vld [vmem:[%s3691_s18 + $0x6c] ss:$16 sps:$4 sm:$0xff]  }
 0x1fc   : > { %2554 = vmatprep.mubr.msk.bf16.mxu1 %vm3213_vm0, %v3212_v1  ;;  %2553 = vmatpush3.bf16.msra.mxu1 %v1129_v52  ;;  %v2798_v52 = vld [vmem:[%s3691_s18 + $0xac] ss:$16 sps:$4 sm:$0xff]  }
 0x1fd   : > { %1527 = vmatprep.subr.bf16.mxu1 %v2765_v26  ;;  %v2826_v26 = vld [vmem:[%s3694_s15 + $0x98] sm:$0xff]  }
 0x2ce   : > { %v1105_v53 = vpop.f32.mrb[4].mxu1 }
 0x2cf   : > { %v2550_v54 = vpop.f32.mrb[5].mxu1  ;;  %v1112_v55 = vsel %vm1111_vm2, %v1105_v53, -inf }
 0x2d0   : > { %1113 = vmax.xlane.f32.xlu0 %v1112_v55  ;;  %v1108_v56 = vpop.f32.mrb[6].mxu1  ;;  %v2796_v54 = vld [vmem:[%s3691_s18 + $0xa8] ss:$16 sps:$4 sm:$0xff]   ;;  %v2801_v55 = vld [vmem:[%s3691_s18 + $0xc4] ss:$16 sps:$4 sm:$0xff]  }
 0x2d1   : > { %v2551_v57 = vpop.f32.mrb[7].mxu1  ;;  %v2804_v56 = vld [vmem:[%s3691_s18 + $0xcc] ss:$16 sps:$4 sm:$0xff]  }
 0x2d2   : > { %v2799_v57 = vld [vmem:[%s3691_s18 + $0xc0] ss:$16 sps:$4 sm:$0xff]  }
 0x35d   : > { %v1114_v58 = vpop.xlane.xlu0 %1113 }
 0x35e   : > { %v1115_v59 = vsub.f32 %v1105_v53, %v1114_v58  ;;  %v2793_v53 = vld [vmem:[%s3691_s18 + $0xa0] ss:$16 sps:$4 sm:$0xff]   ;;  %v2802_v58 = vld [vmem:[%s3691_s18 + $0xc8] ss:$16 sps:$4 sm:$0xff]  }
 0x360   : > { %v1116_v60 = vmul.f32 1.442695, %v1115_v59  ;;  %v2807_v59 = vld [vmem:[%s3691_s18 + $0xe4] ss:$16 sps:$4 sm:$0xff]  }
 0x362   : > { %2843 = vpow2.f32 %v1116_v60  ;;  %v2805_v60 = vld [vmem:[%s3691_s18 + $0xe0] ss:$16 sps:$4 sm:$0xff]  }
 0x36c   : > { %v2844_v61 = vpop.eup %2843 }
 0x36d   : > { %v1118_v62 = vsel %vm1111_vm2, %v2844_v61, 0.0 }
 0x36e   : > { %1119 = vadd.xlane.f32.xlu0 %v1118_v62  ;;  %v2810_v62 = vld [vmem:[%s3691_s18 + $0xec] ss:$16 sps:$4 sm:$0xff]  }
 0x3fb   : > { %v1120_v8 = vpop.xlane.xlu0 %1119 }
 0x3fc   : > { %2845 = vrcp.f32 %v1120_v8 }
 0x406   : > { %v2846_v9 = vpop.eup %2845 }
 0x407   : > { %v1122_v10 = vmul.f32 %v2846_v9, %v2844_v61  ;;  %v2808_v61 = vld [vmem:[%s3691_s18 + $0xe8] ss:$16 sps:$4 sm:$0xff]  }
 0x409   : > { %v1123_v11 = vpack.c.bf16 %v1122_v10, %v1122_v10  ;;  %1989 = vst.msk [vmem:[%s782_s13] sm:$0xff] %vm1111_vm2, %v1122_v10 }
 0x40b   : > { %2555 = vmatmul.mubr.msk.bf16.vlgmr.msra.gmra.mrb[8].mxu1 %vm1111_vm2, %v1123_v11 }
 0x40c   : > { %1559 = vmatprep.mubr.bf16.mxu1 %v3211_v0  ;;  %1528 = vmatpush1.bf16.msra.mxu1 %v2763_v25  ;;  %v2825_v25 = vld [vmem:[%s3694_s15 + $0x18] sm:$0xff]  }
 0x4de   : > { %v1165_v13 = vpop.f32.mrb[8].mxu1 }
 0x4df   : > { %v1171_v1 = vpack.c.bf16 %v1165_v13, %v1165_v13  ;;  %v2556_v14 = vpop.f32.mrb[9].mxu1  ;;  %v2814_v13 = vld [vmem:[%s3694_s15 + $0x80] sm:$0xff]  }
 0x4e0   : > { %v1168_v15 = vpop.f32.mrb[10].mxu1  ;;  %v2815_v14 = vld [vmem:[%s3694_s15 + $0x48] sm:$0xff]  }
 0x4e1   : > { %v2557_v16 = vpop.f32.mrb[11].mxu1  ;;  %2575 = vmatmul.mubr.bf16.vlgmr.msra.gmra.mrb[4].mxu0 %v1171_v1  ;;  %v2816_v15 = vld [vmem:[%s3694_s15 + $0xc8] sm:$0xff]  }
 0x4e2   : > { %1600 = vmatprep.mubr.bf16.mxu0 %v3211_v0  ;;  %v2771_v0 = vld [vmem:[%s3691_s18 + $0x24] ss:$16 sps:$4 sm:$0xff]   ;;  %1569 = vmatpush1.bf16.msra.mxu0 %v2766_v27  ;;  %v2817_v16 = vld [vmem:[%s3694_s15 + $0x8] sm:$0xff]  }
 0x4e3   : > { %1529 = vmatprep.subr.bf16.mxu1 %v2771_v0  ;;  %1570 = vmatprep.subr.bf16.mxu0 %v2774_v31  ;;  %v2827_v27 = vld [vmem:[%s3694_s15 + $0x60] sm:$0xff]  }
 0x4e4   : > { %1530 = vmatpush1.bf16.msra.mxu1 %v2769_v33  ;;  %v2829_v0 = vld [vmem:[%s3694_s15 + $0x20] sm:$0xff]   ;;  %v2831_v33 = vld [vmem:[%s3694_s15 + $0x68] sm:$0xff]  }
 0x4e5   : > { %1531 = vmatprep.subr.bf16.mxu1 %v2777_v35  ;;  %v2830_v31 = vld [vmem:[%s3694_s15 + $0xa0] sm:$0xff]   ;;  %v2833_v35 = vld [vmem:[%s3694_s15 + $0x28] sm:$0xff]  }
 0x4e6   : > { %1571 = vmatpush1.bf16.msra.mxu0 %v2772_v34  ;;  %v2832_v34 = vld [vmem:[%s3694_s15 + $0xe8] sm:$0xff]  }
 0x4e8   : > { %1532 = vmatpush1.bf16.msra.mxu1 %v2775_v36  ;;  %v2835_v36 = vld [vmem:[%s3694_s15 + $0x70] sm:$0xff]  }
 0x4e9   : > { %1533 = vmatprep.subr.bf16.mxu1 %v2783_v42  ;;  %v2841_v42 = vld [vmem:[%s3694_s15 + $0x38] sm:$0xff]  }
 0x4ec   : > { %1534 = vmatpush1.bf16.msra.mxu1 %v2781_v45  ;;  %v1345_v45 = vld [vmem:[%s796_s12] sm:$0xf]  ;;  %s3031_s12 = scalar_lea.vmem %s2027_s21, 128 }
 0x4ed   : > { %1535 = vmatprep.subr.bf16.mxu1 %v2789_v47  ;;  %v1350_v47 = vrot.slane %v1345_v45, %v845_v32  ;;  %p3032_p8 = scmp.ne.s32.totalorder %s2027_s21, %s3031_s12 }
 0x4ef   : > { %p3033_p9 = pnand %p3032_p8, %p4084_p13 }
 0x4f0   : > { %1536 = vmatpush1.bf16.msra.mxu1 %v2787_v49  ;;  %v1354_v49 = vrot.slane %v1345_v45, %v849_v30 }
 0x4f1   : > { %1537 = vmatprep.subr.bf16.mxu1 %v2795_v51  ;;  %p3034_p11 = pneg %p3033_p9 }
 0x4f4   : > { %1538 = vmatpush1.bf16.msra.mxu1 %v2793_v53 }
 0x4f5   : > { %1539 = vmatprep.subr.bf16.mxu1 %v2801_v55 }
 0x4f8   : > { %1540 = vmatpush1.bf16.msra.mxu1 %v2799_v57 }
 0x4f9   : > { %1541 = vmatprep.subr.bf16.mxu1 %v2807_v59 }
 0x4fc   : > { %1542 = vmatpush1.bf16.msra.mxu1 %v2805_v60 }
 0x4fd   : > { %2482 = vmatprep.subr.bf16.mxu1 %v2811_v63 }
 0x5b4   : > { %v1277_v18 = vpop.f32.mrb[4].mxu0 }
 0x5b5   : > { %v1278_v19 = vadd.f32 %v2371_v17, %v1277_v18  ;;  %v2576_v20 = vpop.f32.mrb[5].mxu0  ;;  %v2818_v17 = vld [vmem:[%s3694_s15 + $0x88] sm:$0xff]   ;;  %v2819_v18 = vld [vmem:[%s3694_s15 + $0x50] sm:$0xff]  }
 0x5b6   : > { %v1280_v21 = vpop.f32.mrb[6].mxu0  ;;  %v2821_v20 = vld [vmem:[%s3694_s15 + $0x10] sm:$0xff]  }
 0x5b7   : > { %v2577_v22 = vpop.f32.mrb[7].mxu0  ;;  %v1283_v24 = vadd.f32 %v1278_v19, %v3728_v23  ;;  %v2780_v23 = vld [vmem:[%s3691_s18 + $0x4c] ss:$16 sps:$4 sm:$0xff]   ;;  %s792_s18 = scalar_lea.vmem %s4079_s28, %s3749_s6  ;;  %v2820_v19 = vld [vmem:[%s3694_s15 + $0xd0] sm:$0xff]  }
 0x5b8   : > { %1572 = vmatprep.subr.bf16.mxu0 %v2780_v23  ;;  %v2381_v9 = vld [vmem:[%s792_s18] ss:$0 sm:$0xff]  ;;  %v2822_v21 = vld [vmem:[%s3694_s15 + $0x90] sm:$0xff]   ;;  %v2823_v22 = vld [vmem:[%s3694_s15 + $0x58] sm:$0xff]  }
 0x5b9   : > { %1286 = vadd.xlane.f32.xlu1 %v1283_v24  ;;  %1573 = vmatpush1.bf16.msra.mxu0 %v2778_v37  ;;  %v2834_v23 = vld [vmem:[%s3694_s15 + $0xa8] sm:$0xff]   ;;  %v2836_v37 = vld [vmem:[%s3694_s15 + $0xf0] sm:$0xff]  }
 0x5ba   : > { %1574 = vmatprep.subr.bf16.mxu0 %v2786_v43  ;;  %v2842_v43 = vld [vmem:[%s3694_s15 + $0xb8] sm:$0xff]  }
 0x5bd   : > { %1575 = vmatpush1.bf16.msra.mxu0 %v2784_v46  ;;  %v1361_v46 = vsub.s32 3, %v3752_v29 }
 0x5be   : > { %1576 = vmatprep.subr.bf16.mxu0 %v2792_v48  ;;  %v1358_v48 = vrot.slane %v1345_v45, %v853_v44 }
 0x5c1   : > { %1577 = vmatpush1.bf16.msra.mxu0 %v2790_v50  ;;  %v1362_v50 = vrot.slane %v1345_v45, %v1361_v46 }
 0x5c2   : > { %1578 = vmatprep.subr.bf16.mxu0 %v2798_v52 }
 0x5c5   : > { %1579 = vmatpush1.bf16.msra.mxu0 %v2796_v54 }
 0x5c6   : > { %1580 = vmatprep.subr.bf16.mxu0 %v2804_v56 }
 0x5c9   : > { %1581 = vmatpush1.bf16.msra.mxu0 %v2802_v58 }
 0x5ca   : > { %1582 = vmatprep.subr.bf16.mxu0 %v2810_v62 }
 0x5cd   : > { %1583 = vmatpush1.bf16.msra.mxu0 %v2808_v61 }
 0x5ce   : > { %2504 = vmatprep.subr.bf16.mxu0 %v2812_v2 }
 0x646   : > { %v1287_v38 = vpop.xlane.xlu1 %1286 }
 0x647   : > { %v1289_v39 = vmul.f32 0.0078125, %v1287_v38  ;;  %v2837_v38 = vld [vmem:[%s3694_s15 + $0x30] sm:$0xff]  }
 0x649   : > { %v1290_v40 = vsub.f32 %v1283_v24, %v1289_v39  ;;  %v2824_v24 = vld [vmem:[%s3694_s15 + $0xd8] sm:$0xff]   ;;  %v2838_v39 = vld [vmem:[%s3694_s15 + $0xb0] sm:$0xff]  }
 0x64b   : > { %v1291_v41 = vmul.f32 %v1290_v40, %v1290_v40 }
 0x64d   : > { %1292 = vadd.xlane.f32.xlu1 %v1291_v41  ;;  %v2840_v41 = vld [vmem:[%s3694_s15 + $0xf8] sm:$0xff]  }
 0x6da   : > { %v1293_v3 = vpop.xlane.xlu1 %1292 }
 0x6db   : > { %v1294_v4 = vmul.f32 0.0078125, %v1293_v3 }
 0x6dd   : > { %v1295_v5 = vadd.f32 1e-05, %v1294_v4 }
 0x6df   : > { %2847 = vrsqrt.f32 %v1295_v5 }
 0x6e9   : > { %v2848_v6 = vpop.eup %2847 }
 0x6ea   : > { %v1297_v8 = vmul.f32 %v2848_v6, %v1290_v40  ;;  %v2839_v40 = vld [vmem:[%s3694_s15 + $0x78] sm:$0xff]   ;;  %s3035_s15 = sshll.u32 %s3214_s19, 4  ;;  %s3036_s15 = int_to_ptr.vmem [resolvable:$false] %s3035_s15 }
 0x6eb   : > { %s3037_s10 = scalar_lea.vmem %s3036_s15, 256  ;;  %p3038_p12 = scmp.lt.s32.totalorder %s2027_s21, %s3036_s15 }
 0x6ec   : > { %v1304_v10 = vmul.f32 %v2380_v7, %v1297_v8  ;;  %v2414_v7 = vld [vmem:[%s799_s8] ss:$0 sm:$0xff]  ;;  %p3039_p10 = scmp.lt.s32.totalorder %s3037_s10, %s3031_s12 }
 0x6ee   : > { %v3838_v11 = vadd.f32 %v2381_v9, %v1304_v10  ;;  %p3040_p2 = por %p3039_p10, %p3038_p12 }
 0x6f0   : > { %v1312_v1 = vpack.c.bf16 %v3838_v11, %v3838_v11  ;;  %p3041_p0 = pnand %p3040_p2, %p3034_p11 }
 0x6f2   : > { %1560 = vmatmul.mubr.bf16.vlgmr.msra.gmra.mrb[12].mxu1 %v1312_v1  ;;  %1601 = vmatmul.mubr.bf16.vlgmr.msra.gmra.mrb[8].mxu0 %v1312_v1 }
 0x6f3   : > { %2483 = vmatpush3.bf16.msra.mxu1 %v2813_v12  ;;  %2505 = vmatpush3.bf16.msra.mxu0 %v2814_v13 }
 0x6f4   : > { %2484 = vmatprep.subr.bf16.mxu1 %v2815_v14  ;;  %2506 = vmatprep.subr.bf16.mxu0 %v2816_v15 }
 0x6f7   : > { %2485 = vmatpush3.bf16.msra.mxu1 %v2817_v16  ;;  %2507 = vmatpush3.bf16.msra.mxu0 %v2818_v17 }
 0x6f8   : > { %2486 = vmatprep.subr.bf16.mxu1 %v2819_v18  ;;  %2508 = vmatprep.subr.bf16.mxu0 %v2820_v19 }
 0x6fb   : > { %2487 = vmatpush3.bf16.msra.mxu1 %v2821_v20  ;;  %2509 = vmatpush3.bf16.msra.mxu0 %v2822_v21 }
 0x6fc   : > { %2488 = vmatprep.subr.bf16.mxu1 %v2823_v22  ;;  %2510 = vmatprep.subr.bf16.mxu0 %v2824_v24 }
 0x6ff   : > { %2489 = vmatpush3.bf16.msra.mxu1 %v2825_v25  ;;  %2511 = vmatpush3.bf16.msra.mxu0 %v2826_v26 }
 0x700   : > { %2490 = vmatprep.subr.bf16.mxu1 %v2827_v27  ;;  %2512 = vmatprep.subr.bf16.mxu0 %v2828_v28 }
 0x703   : > { %2491 = vmatpush3.bf16.msra.mxu1 %v2829_v0  ;;  %2513 = vmatpush3.bf16.msra.mxu0 %v2830_v31 }
 0x704   : > { %2492 = vmatprep.subr.bf16.mxu1 %v2831_v33  ;;  %2514 = vmatprep.subr.bf16.mxu0 %v2832_v34 }
 0x707   : > { %2493 = vmatpush3.bf16.msra.mxu1 %v2833_v35  ;;  %2515 = vmatpush3.bf16.msra.mxu0 %v2834_v23 }
 0x708   : > { %2494 = vmatprep.subr.bf16.mxu1 %v2835_v36  ;;  %2516 = vmatprep.subr.bf16.mxu0 %v2836_v37 }
 0x70b   : > { %2495 = vmatpush3.bf16.msra.mxu1 %v2837_v38  ;;  %2517 = vmatpush3.bf16.msra.mxu0 %v2838_v39 }
 0x70c   : > { %2496 = vmatprep.subr.bf16.mxu1 %v2839_v40  ;;  %2518 = vmatprep.subr.bf16.mxu0 %v2840_v41 }
 0x70f   : > { %2497 = vmatpush3.bf16.msra.mxu1 %v2841_v42  ;;  %2519 = vmatpush3.bf16.msra.mxu0 %v2842_v43 }
 0x7c5   : > { %v1561_v51 = vpop.f32.mrb[12].mxu1  ;;  %v1602_v52 = vpop.f32.mrb[8].mxu0 }
 0x7c6   : > { %v1562_v53 = vadd.f32 %v1561_v51, %v1350_v47  ;;  %v1603_v54 = vadd.f32 %v1602_v52, %v1358_v48  ;;  %v1563_v55 = vpop.f32.mrb[13].mxu1  ;;  %v1604_v56 = vpop.f32.mrb[9].mxu0 }
 0x7c7   : > { %v1564_v57 = vadd.f32 %v1563_v55, %v1354_v49  ;;  %v1605_v58 = vadd.f32 %v1604_v56, %v1362_v50  ;;  %v1565_v59 = vpop.f32.mrb[14].mxu1  ;;  %v1606_v60 = vpop.f32.mrb[10].mxu0 }
 0x7c8   : > { %v1609_v61 = vmax.f32 %v1562_v53, 0.0  ;;  %v1611_v32 = vmax.f32 %v1603_v54, 0.0  ;;  %v1566_v62 = vpop.f32.mrb[15].mxu1  ;;  %v1607_v63 = vpop.f32.mrb[11].mxu0 }
 0x7c9   : > { %v1610_v44 = vmax.f32 %v1564_v57, 0.0  ;;  %v1612_v2 = vmax.f32 %v1605_v58, 0.0 }
 0x7ca   : > { %v1613_v3 = vpack.c.bf16 %v1609_v61, %v1609_v61  ;;  %v1615_v4 = vpack.c.bf16 %v1611_v32, %v1611_v32 }
 0x7cb   : > { %v1614_v29 = vpack.c.bf16 %v1610_v44, %v1610_v44  ;;  %v1616_v30 = vpack.c.bf16 %v1612_v2, %v1612_v2 }
 0x7cd   : > { %1912 = vmatprep.mubr.bf16.mxu1 %v1614_v29  ;;  %1952 = vmatprep.mubr.bf16.mxu0 %v1616_v30 }
 0x7ce   : > { %1913 = vmatmul.mubr.bf16.vlgmr.msra.gmra.mrb[16].mxu1 %v1613_v3  ;;  %1953 = vmatmul.mubr.bf16.vlgmr.msra.gmra.mrb[12].mxu0 %v1615_v4 }
 0x8a1   : > { %v2498_v5 = vpop.f32.mrb[16].mxu1  ;;  %v2520_v6 = vpop.f32.mrb[12].mxu0 }
 0x8a2   : > { %v2499_v8 = vpop.f32.mrb[17].mxu1  ;;  %v2521_v9 = vpop.f32.mrb[13].mxu0 }
 0x8a3   : > { %v2500_v10 = vadd.f32 %v2499_v8, %v2498_v5  ;;  %v2522_v12 = vadd.f32 %v2521_v9, %v2520_v6  ;;  %v2501_v13 = vpop.f32.mrb[18].mxu1  ;;  %v2523_v1 = vpop.f32.mrb[14].mxu0 }
 0x8a4   : > { %v2502_v14 = vpop.f32.mrb[19].mxu1  ;;  %v2524_v15 = vpop.f32.mrb[15].mxu0 }
 0x8a5   : > { %v1915_v16 = vadd.f32 %v2500_v10, %v2414_v7 }
 0x8a7   : > { %v1955_v17 = vadd.f32 %v2522_v12, %v1915_v16 }
 0x8a9   : > { %v1960_v18 = vadd.f32 %v1955_v17, %v3838_v11 }
 0x8ab   : > { %1963 = vadd.xlane.f32.xlu0 %v1960_v18 }
 0x938   : > { %v1964_v19 = vpop.xlane.xlu0 %1963 }
 0x939   : > { %v1965_v20 = vmul.f32 0.0078125, %v1964_v19 }
 0x93b   : > { %v1966_v21 = vsub.f32 %v1960_v18, %v1965_v20 }
 0x93d   : > { %v1967_v22 = vmul.f32 %v1966_v21, %v1966_v21 }
 0x93f   : > { %1968 = vadd.xlane.f32.xlu1 %v1967_v22 }
 0x940   : > { %3044 = shalt.err (!%p3041_p0)
}
 0x941   : > { %s3045_s13 = scalar_lea.hbm %s3898_s27, 128  ;;  %s3049_s1 = scalar_lea.hbm %s4083_s5, 512 }
 0x942   : > { %p3046_p1 = scmp.ne.s32.totalorder %s3898_s27, %s3045_s13  ;;  %p3050_p5 = scmp.lt.u32.totalorder %s3898_s27, %s4083_s5 }
 0x943   : > { %p3051_p4 = scmp.lt.u32.totalorder %s3049_s1, %s3045_s13  ;;  %p3053_p8 = scmp.lt.u32.totalorder %s3045_s13, %s3898_s27 }
 0x944   : > { %p3047_p7 = pnand %p3046_p1, %p4084_p13 }
 0x945   : > { %p3052_p3 = por %p3051_p4, %p3050_p5 }
 0x946   : > { %p3048_p6 = pneg %p3047_p7 }
 0x947   : > { %p3054_p9 = por %p3053_p8, %p3052_p3 }
 0x949   : > { %p3055_p11 = pnand %p3054_p9, %p3048_p6 }
 0x94b   : > { %3058 = shalt.err (!%p3055_p11)
}
 0x94c   : > { %2595 = dma.vmem_to_hbm [thread:$0]  (%p4084_p13), %s2027_s21, 128, %s3898_s27, %s1996_s25  }
 0x94d   : > { %s4085_s19 = sld [smem:[#allocation40_spill]]  ;;  %s4086_s24 = sld [smem:[#allocation41_spill]] }
 0x94e   : > { %s775_s1 = scalar_lea.vmem [#allocation13], %s3663_s14  ;;  %s4087_s11 = sld [smem:[#allocation42_spill]] }
 0x94f   : > { %s2011_s27 = sshll.u32 %s775_s1, 4  ;;  %s3215_s14 = smov [#allocation13]   ;;  %s3936_s27 = int_to_ptr.vmem [resolvable:$true] %s2011_s27 }
 0x950   : > { %s3059_s18 = scalar_lea.vmem %s3936_s27, 128  ;;  %s3063_s12 = sshll.u32 %s3215_s14, 4  ;;  %s3064_s12 = int_to_ptr.vmem [resolvable:$false] %s3063_s12 }
 0x951   : > { %p3060_p12 = scmp.ne.s32.totalorder %s3936_s27, %s3059_s18  ;;  %s3065_s26 = scalar_lea.vmem %s3064_s12, 256 }
 0x952   : > { %p3066_p0 = scmp.lt.s32.totalorder %s3936_s27, %s3064_s12  ;;  %p3067_p1 = scmp.lt.s32.totalorder %s3065_s26, %s3059_s18 }
 0x953   : > { %s802_s15 = scalar_lea.vmem %s4085_s19, %s3749_s6  ;;  %s805_s8 = scalar_lea.vmem %s4086_s24, %s3749_s6 }
 0x954   : > { %v2447_v27 = vld [vmem:[%s802_s15] ss:$0 sm:$0xff]  ;;  %s3934_s28 = scalar_lea.hbm %s4087_s11, %s2452_s20  ;;  %s1991_s6 = scalar_lea.sflag [#allocation4], %s3660_s4 }
 0x955   : > { %v2448_v0 = vld [vmem:[%s805_s8] ss:$0 sm:$0xff]  ;;  %p3061_p10 = pnand %p3060_p12, %p4084_p13  ;;  %p3068_p7 = por %p3067_p1, %p3066_p0 }
 0x957   : > { %p3062_p2 = pneg %p3061_p10 }
 0x959   : > { %p3069_p6 = pnand %p3068_p7, %p3062_p2 }
 0x9cc   : > { %v1969_v11 = vpop.xlane.xlu1 %1968 }
 0x9cd   : > { %v1970_v24 = vmul.f32 0.0078125, %v1969_v11 }
 0x9cf   : > { %v1971_v25 = vadd.f32 1e-05, %v1970_v24 }
 0x9d1   : > { %2849 = vrsqrt.f32 %v1971_v25 }
 0x9db   : > { %v2850_v26 = vpop.eup %2849 }
 0x9dc   : > { %v1973_v28 = vmul.f32 %v2850_v26, %v1966_v21 }
 0x9de   : > { %v1980_v31 = vmul.f32 %v2447_v27, %v1973_v28 }
 0x9e0   : > { %v1987_v33 = vadd.f32 %v2448_v0, %v1980_v31 }
 0x9e2   : > { %1988 = vst [vmem:[%s775_s1] sm:$0xff] %v1987_v33 }
 0x9e3   : > { %3072 = shalt.err (!%p3069_p6)
}
 0x9e4   : > { %s3073_s4 = scalar_lea.hbm %s3934_s28, 128  ;;  %s3077_s15 = scalar_lea.hbm %s4087_s11, 512 }
 0x9e5   : > { %p3074_p5 = scmp.ne.s32.totalorder %s3934_s28, %s3073_s4  ;;  %p3078_p8 = scmp.lt.u32.totalorder %s3934_s28, %s4087_s11 }
 0x9e6   : > { %p3079_p9 = scmp.lt.u32.totalorder %s3077_s15, %s3073_s4  ;;  %p3081_p12 = scmp.lt.u32.totalorder %s3073_s4, %s3934_s28 }
 0x9e7   : > { %p3075_p4 = pnand %p3074_p5, %p4084_p13 }
 0x9e8   : > { %p3080_p11 = por %p3079_p9, %p3078_p8 }
 0x9e9   : > { %p3076_p3 = pneg %p3075_p4 }
 0x9ea   : > { %p3082_p10 = por %p3081_p12, %p3080_p11 }
 0x9ec   : > { %p3083_p2 = pnand %p3082_p10, %p3076_p3 }
 0x9ee   : > { %3086 = shalt.err (!%p3083_p2)
}
 0x9ef   : > { %2594 = dma.vmem_to_hbm [thread:$0]  (%p4084_p13), %s3936_s27, 128, %s3934_s28, %s1991_s6  }
 0x9f0 PF: > { %p2625_p0 = scmp.ge.s32.totalorder %s3197_s23, 2  ;;  %s2038_s24 = sand.u32 1, %s3169_s16  }
 0x9f1   : > { %p4088_p1 = scmp.ne.s32.totalorder %s4066_s2, 0  ;;  %s2039_s8 = scalar_lea.sflag [#allocation4], %s2038_s24 }
 0x9f3   : > { %p2618_p7 = pnand %p2625_p0, %p4088_p1 }
 0x9f5   : > { %3148 = dma.done.wait (!%p2618_p7), %s2039_s8, 128  }
 0x9f6   : > { %3150 = vsyncadd (!%p2618_p7), %s2039_s8, 4294967168  ;;  %s2048_s1 = scalar_lea.sflag [#allocation15], %s2038_s24 }
 0x9f7   : > { %3152 = dma.done.wait (!%p2618_p7), %s2048_s1, 128  }
 0x9f8   : > { %3154 = vsyncadd (!%p2618_p7), %s2048_s1, 4294967168  ;;  %s43_s23 = sadd.s32 1, %s3197_s23   ;;  %s4089_s21 = sld [smem:[#allocation22_spill]] }
 0x9f9   : > { %p40_p6 = scmp.ge.s32.totalorder %s43_s23, 6   ;;  %s4090_s15 = sld [smem:[#allocation31_spill]] }
 0x9fa   : > { %s4091_s27 = sld [smem:[#allocation23_spill]]  ;;  %s4092_s18 = sld [smem:[#allocation32_spill]] }
 0x9fb   : > { %s4093_s19 = sld [smem:[#allocation26_spill]]  ;;  %s4094_s25 = sld [smem:[#allocation28_spill]] }
 0x9fc   : > { %s4095_s2 = sld [smem:[#allocation29_spill]]  ;;  %s4096_s29 = smov %s3161_s30 }
 0x9fd   : > { %s4098_s16 = smov %s3173_s17  ;;  %s4100_s20 = smov %s3193_s22 }
 0x9fe   : > { %s4097_s30 = smov %s4089_s21  ;;  %42 = sbr.rel (!%p40_p6) target bundleno = 29 (0x1d), region = 216 }
 0xa00   : > { %s4099_s17 = smov %s4091_s27 }
 0xa01   : > { %s4101_s21 = smov %s4094_s25 }
 0xa02   : > { %s4102_s22 = smov %s4095_s2 }
 0xa05   :  { %2053 = vsyncpa [#allocation3], 1 }
 0xa06   :  { %2055 = vsyncpa [#allocation3 + $0x1], 1 }
 0xa07   :  { %2056 = vsyncpa [#allocation6], 1 }
 0xa08   :  { %2058 = vsyncpa [#allocation6 + $0x1], 1 }
 0xa09   :  { %2059 = vsyncpa [#allocation9], 1 }
 0xa0a   :  { %2061 = vsyncpa [#allocation9 + $0x1], 1 }
 0xa0b   :  { %2062 = vsyncpa [#allocation12], 1 }
 0xa0c   :  { %2064 = vsyncpa [#allocation12 + $0x1], 1 }
 0xa0d   :  { %2065 = vsyncpa [#allocation4], 1 }
 0xa0e   :  { %2067 = vsyncpa [#allocation4 + $0x1], 1 }
 0xa0f   :  { %2068 = vsyncpa [#allocation15], 1 }
 0xa10   :  { %2070 = vsyncpa [#allocation15 + $0x1], 1 }

</bundles_post_ra>
